<compile_context>
chip_gen: v7x
topology: tpu7x:2x2x1
jax: 0.10.0
libtpu: 0.0.40
codegen_flags: <defaults>
</compile_context>

<pallas_src>
import functools

import jax
import jax.numpy as jnp
from jax.experimental import pallas as pl
from jax.experimental.pallas import tpu as pltpu

EPS = 1e-5
LANE = 128


def _round_up(x, m):
    return (x + m - 1) // m * m


def _pad_last(a, c_to):
    c = a.shape[-1]
    if c == c_to:
        return a
    pads = [(0, 0)] * (a.ndim - 1) + [(0, c_to - c)]
    return jnp.pad(a, pads)


def _row_tile(m, c, max_rows=1024, vmem_budget=8 * 1024 * 1024):
    """Largest row tile that divides m, is 8-aligned (or == m) and keeps the
    (3 inputs + 1 output, double-buffered) f32 blocks under vmem_budget."""
    cap = max(1, min(max_rows, m, vmem_budget // (8 * c * 4)))
    for t in range(cap, 0, -1):
        if m % t == 0 and (t % 8 == 0 or t == m):
            return t
    return m


# ---------------------------------------------------------------------------
# Fused conv (3x3 or 1x1, stride s, zero padding) + BatchNorm statistics.
# Optionally applies the previous layer's BN scale/shift + ReLU to the input
# rows on the fly, so the intermediate activation never touches HBM.
# ---------------------------------------------------------------------------
def _conv_bn_stats_kernel(x_ref, w_ref, ss_ref, y_ref, sum_ref, sq_ref, *,
                          ksize, stride, pad, hin, wo, relu_in):
    r = pl.program_id(1)          # output row index (ho)
    t = pl.program_id(2)          # vertical tap (dy)

    hi = r * stride + t - pad     # true input row for this tap
    valid = jnp.logical_and(hi >= 0, hi < hin)

    row = x_ref[0, 0]                                          # (Win, Ci) f32
    if relu_in:                                                # fused bn1 + relu
        row = jnp.maximum(row * ss_ref[0:1, :] + ss_ref[1:2, :], 0.0)
    row = row * valid.astype(row.dtype)                        # zero OOB pad rows

    if pad > 0:                                                # W zero-pad in VMEM
        zc = jnp.zeros((pad, row.shape[1]), row.dtype)
        row = jnp.concatenate([zc, row, zc], axis=0)

    cop = y_ref.shape[-1]
    p = jnp.zeros((wo, cop), jnp.float32)
    for dx in range(ksize):                                    # horizontal taps
        lhs = jax.lax.slice(row, (dx, 0),
                            (dx + stride * (wo - 1) + 1, row.shape[1]),
                            (stride, 1))
        # TODO(synk): cast lhs/w to bf16 on v6e/v7x for MXU rate; kept f32 to
        # stay within 1e-3 of the f32 reference.
        p = p + jnp.dot(lhs, w_ref[0, dx], preferred_element_type=jnp.float32)

    @pl.when(t == 0)
    def _():
        y_ref[0, 0] = p

    @pl.when(t > 0)
    def _():
        y_ref[0, 0] = y_ref[0, 0] + p

    # --- BatchNorm statistics fused into the epilogue ---------------------
    # The per-image stats blocks are revisited across the (r, t) axes, which
    # are both marked "arbitrary"; only the batch axis is "parallel".
    @pl.when(jnp.logical_and(r == 0, t == 0))
    def _():
        sum_ref[...] = jnp.zeros_like(sum_ref)
        sq_ref[...] = jnp.zeros_like(sq_ref)

    @pl.when(t == ksize - 1)                                   # row is complete
    def _():
        yrow = y_ref[0, 0]
        sum_ref[0] = sum_ref[0] + jnp.sum(yrow, axis=0, keepdims=True)
        sq_ref[0] = sq_ref[0] + jnp.sum(yrow * yrow, axis=0, keepdims=True)


def fused_conv_bn_stats(x, w4, *, ksize, stride, pad, relu_in, ss_in=None):
    n, hin, win, ci = x.shape
    kh, kw, ciw, cop = w4.shape
    assert (kh, kw, ciw) == (ksize, ksize, ci)
    ho = (hin + 2 * pad - ksize) // stride + 1
    wo = (win + 2 * pad - ksize) // stride + 1

    if ss_in is None:   # identity input transform
        ss_in = jnp.stack([jnp.ones((ci,), jnp.float32),
                           jnp.zeros((ci,), jnp.float32)])

    kernel = functools.partial(_conv_bn_stats_kernel, ksize=ksize, stride=stride,
                               pad=pad, hin=hin, wo=wo, relu_in=relu_in)
    y, ssum, ssq = pl.pallas_call(
        kernel,
        out_shape=(jax.ShapeDtypeStruct((n, ho, wo, cop), jnp.float32),
                   jax.ShapeDtypeStruct((n, 1, cop), jnp.float32),
                   jax.ShapeDtypeStruct((n, 1, cop), jnp.float32)),
        grid=(n, ho, ksize),
        in_specs=[
            # block size 1 along H -> block index == element offset, so the
            # shifted (and clamped) input row can be selected directly.
            pl.BlockSpec((1, 1, win, ci),
                         lambda b, r, t: (b, jnp.clip(r * stride + t - pad, 0, hin - 1), 0, 0)),
            pl.BlockSpec((1, ksize, ci, cop), lambda b, r, t: (t, 0, 0, 0)),
            pl.BlockSpec((2, ci), lambda b, r, t: (0, 0)),
        ],
        out_specs=(
            pl.BlockSpec((1, 1, wo, cop), lambda b, r, t: (b, r, 0, 0)),
            pl.BlockSpec((1, 1, cop), lambda b, r, t: (b, 0, 0)),
            pl.BlockSpec((1, 1, cop), lambda b, r, t: (b, 0, 0)),
        ),
        compiler_params=pltpu.CompilerParams(
            dimension_semantics=("parallel", "arbitrary", "arbitrary")),
    )(x, w4, ss_in)
    return y, ssum, ssq


# ---------------------------------------------------------------------------
# Fused bn2 + shortcut(-BN) + residual add + ReLU over flat lane-dense tiles.
# ---------------------------------------------------------------------------
def _bn_add_relu_kernel(y_ref, ssy_ref, r_ref, ssr_ref, o_ref):
    out = (y_ref[...] * ssy_ref[0:1, :] + ssy_ref[1:2, :]
           + r_ref[...] * ssr_ref[0:1, :] + ssr_ref[1:2, :])
    o_ref[...] = jnp.maximum(out, 0.0)


def fused_bn_add_relu(y, ssy, res, ssr):
    m, c = y.shape
    tm = _row_tile(m, c)
    return pl.pallas_call(
        _bn_add_relu_kernel,
        out_shape=jax.ShapeDtypeStruct((m, c), jnp.float32),
        grid=(m // tm,),
        in_specs=[pl.BlockSpec((tm, c), lambda i: (i, 0)),
                  pl.BlockSpec((2, c), lambda i: (0, 0)),
                  pl.BlockSpec((tm, c), lambda i: (i, 0)),
                  pl.BlockSpec((2, c), lambda i: (0, 0))],
        out_specs=pl.BlockSpec((tm, c), lambda i: (i, 0)),
        compiler_params=pltpu.CompilerParams(dimension_semantics=("parallel",)),
    )(y, ssy, res, ssr)


# ---------------------------------------------------------------------------
# JAX glue
# ---------------------------------------------------------------------------
def _w_to_4d(w, cip, cop):
    # PyTorch conv weight [Cout, Cin, kh, kw] -> [kh, kw, Cip, Cop], zero-padded.
    cout, cin, kh, kw = w.shape
    w4 = jnp.transpose(w, (2, 3, 1, 0)).astype(jnp.float32)
    return jnp.pad(w4, ((0, 0), (0, 0), (0, cip - cin), (0, cop - cout)))


def _bn_scale_shift(sums, sqs, count, gamma, beta, cop):
    s = jnp.sum(sums, axis=(0, 1))
    q = jnp.sum(sqs, axis=(0, 1))
    mean = s / count
    var = jnp.maximum(q / count - mean * mean, 0.0)   # biased var, clamped >= 0
    g = _pad_last(gamma.astype(jnp.float32), cop)     # padded channels: gamma=0 -> stay 0
    b = _pad_last(beta.astype(jnp.float32), cop)
    scale = g * jax.lax.rsqrt(var + EPS)
    shift = b - mean * scale
    return jnp.stack([scale, shift], axis=0)          # (2, Cop)


def residual_block_forward(x_nchw, params, stride=1):
    x = jnp.transpose(x_nchw, (0, 2, 3, 1)).astype(jnp.float32)   # NHWC
    n, h, w, cin = x.shape
    cout = params["w1"].shape[0]
    cip = _round_up(cin, LANE)
    cop = _round_up(cout, LANE)

    xc = _pad_last(x, cip)                             # lane-dense channels
    ho = (h + 2 - 3) // stride + 1
    wo = (w + 2 - 3) // stride + 1
    m = n * ho * wo

    # conv1 (+ bn1 statistics fused in the epilogue)
    y1, s1, q1 = fused_conv_bn_stats(xc, _w_to_4d(params["w1"], cip, cop),
                                     ksize=3, stride=stride, pad=1, relu_in=False)
    ss1 = _bn_scale_shift(s1, q1, m, params["g1"], params["b1"], cop)

    # conv2 (+ bn2 statistics); bn1 + ReLU applied on the fly to its input rows
    y2, s2, q2 = fused_conv_bn_stats(y1, _w_to_4d(params["w2"], cop, cop),
                                     ksize=3, stride=1, pad=1, relu_in=True, ss_in=ss1)
    ss2 = _bn_scale_shift(s2, q2, m, params["g2"], params["b2"], cop)

    # shortcut
    if stride != 1 or cin != cout:                     # projection: 1x1 conv + BN
        ys, ssc, qsc = fused_conv_bn_stats(xc, _w_to_4d(params["ws"], cip, cop),
                                           ksize=1, stride=stride, pad=0, relu_in=False)
        sss = _bn_scale_shift(ssc, qsc, m, params["gs"], params["bs"], cop)
        short = ys.reshape(m, cop)
    else:                                              # identity (cip == cop)
        short = xc.reshape(m, cop)
        sss = jnp.stack([jnp.ones((cop,), jnp.float32),
                         jnp.zeros((cop,), jnp.float32)])

    # bn2 + shortcut(-bn) + add + relu in one lane-dense pass
    out = fused_bn_add_relu(y2.reshape(m, cop), ss2, short, sss)
    out = out.reshape(n, ho, wo, cop)[..., :cout]
    return jnp.transpose(out, (0, 3, 1, 2))            # back to NCHW


# ---------------------------------------------------------------------------
# reference (pure JAX)
# ---------------------------------------------------------------------------
def _ref_forward(x, params, stride):
    def conv(x, w, s, pad):
        return jax.lax.conv_general_dilated(
            x, w, (s, s), ((pad, pad), (pad, pad)),
            dimension_numbers=("NCHW", "OIHW", "NCHW"))

    def bn(y, g, b):
        mean = jnp.mean(y, axis=(0, 2, 3), keepdims=True)
        var = jnp.var(y, axis=(0, 2, 3), keepdims=True)
        return (y - mean) / jnp.sqrt(var + EPS) * g.reshape(1, -1, 1, 1) + b.reshape(1, -1, 1, 1)

    out = jnp.maximum(bn(conv(x, params["w1"], stride, 1), params["g1"], params["b1"]), 0.0)
    out = bn(conv(out, params["w2"], 1, 1), params["g2"], params["b2"])
    if "ws" in params:
        sc = bn(conv(x, params["ws"], stride, 0), params["gs"], params["bs"])
    else:
        sc = x
    return jnp.maximum(out + sc, 0.0)


# ---------------------------------------------------------------------------
# main
# ---------------------------------------------------------------------------
if __name__ == "__main__":
    key = jax.random.PRNGKey(0)
    N, C_IN, C_OUT, H, W, STRIDE = 2, 4, 8, 16, 16, 1   # Cin != Cout -> projection shortcut

    ks = jax.random.split(key, 10)
    params = {
        "w1": 0.1 * jax.random.normal(ks[0], (C_OUT, C_IN, 3, 3), jnp.float32),
        "g1": 1.0 + 0.1 * jax.random.normal(ks[1], (C_OUT,), jnp.float32),
        "b1": 0.1 * jax.random.normal(ks[2], (C_OUT,), jnp.float32),
        "w2": 0.1 * jax.random.normal(ks[3], (C_OUT, C_OUT, 3, 3), jnp.float32),
        "g2": 1.0 + 0.1 * jax.random.normal(ks[4], (C_OUT,), jnp.float32),
        "b2": 0.1 * jax.random.normal(ks[5], (C_OUT,), jnp.float32),
        "ws": 0.1 * jax.random.normal(ks[6], (C_OUT, C_IN, 1, 1), jnp.float32),
        "gs": 1.0 + 0.1 * jax.random.normal(ks[7], (C_OUT,), jnp.float32),
        "bs": 0.1 * jax.random.normal(ks[8], (C_OUT,), jnp.float32),
    }
    x = jax.random.normal(ks[9], (N, C_IN, H, W), jnp.float32)

    fwd = jax.jit(residual_block_forward, static_argnames=("stride",))
    out = jax.block_until_ready(fwd(x, params, stride=STRIDE))

    ref = jax.block_until_ready(_ref_forward(x, params, STRIDE))
    err = float(jnp.max(jnp.abs(out - ref)))
    assert out.shape == (N, C_OUT, H // STRIDE, W // STRIDE), out.shape
    assert err < 1e-3, f"mismatch vs reference, max abs err = {err}"
    print("KERNEL_OK")
</pallas_src>

<mosaic_0001>
module attributes {stable_mosaic.version = 11 : i64} {
  func.func @_conv_bn_stats_kernel(%arg0: i32, %arg1: i32, %arg2: i32, %arg3: memref<1x1x16x128xf32, #tpu.memory_space<vmem>>, %arg4: memref<1x3x128x128xf32, #tpu.memory_space<vmem>>, %arg5: memref<2x128xf32, #tpu.memory_space<vmem>>, %arg6: memref<1x1x16x128xf32, #tpu.memory_space<vmem>>, %arg7: memref<1x1x128xf32, #tpu.memory_space<vmem>>, %arg8: memref<1x1x128xf32, #tpu.memory_space<vmem>>) attributes {dimension_semantics = [#tpu.dimension_semantics<parallel>, #tpu.dimension_semantics<arbitrary>, #tpu.dimension_semantics<arbitrary>], iteration_bounds = array<i64: 2, 16, 3>, scalar_prefetch = 0 : i64, scratch_operands = 0 : i64, tpu.core_type = #tpu.core_type<tc>, window_params = [{transform_indices = @transform_0, window_bounds = array<i64: 1, 1, 16, 128>}, {transform_indices = @transform_1, window_bounds = array<i64: 1, 3, 128, 128>}, {pipeline_mode = #tpu.pipeline_mode<synchronous>, transform_indices = @transform_2, window_bounds = array<i64: 2, 128>}, {transform_indices = @transform_3, window_bounds = array<i64: 1, 1, 16, 128>}, {transform_indices = @transform_4, window_bounds = array<i64: 1, 1, 128>}, {transform_indices = @transform_5, window_bounds = array<i64: 1, 1, 128>}]} {
    %c1_i32 = arith.constant 1 : i32
    %0 = arith.muli %arg1, %c1_i32 : i32
    %1 = arith.addi %0, %arg2 : i32
    %c1_i32_0 = arith.constant 1 : i32
    %2 = arith.subi %1, %c1_i32_0 : i32
    %c0_i32 = arith.constant 0 : i32
    %3 = arith.cmpi sge, %2, %c0_i32 : i32
    %c16_i32 = arith.constant 16 : i32
    %4 = arith.cmpi slt, %2, %c16_i32 : i32
    %5 = arith.andi %3, %4 : i1
    %c0 = arith.constant 0 : index
    %c0_1 = arith.constant 0 : index
    %c0_2 = arith.constant 0 : index
    %c0_3 = arith.constant 0 : index
    %6 = vector.load %arg3[%c0, %c0_1, %c0_2, %c0_3] : memref<1x1x16x128xf32, #tpu.memory_space<vmem>>, vector<1x1x16x128xf32>
    %7 = vector.shape_cast %6 : vector<1x1x16x128xf32> to vector<16x128xf32>
    %8 = arith.extui %5 : i1 to i32
    %9 = arith.sitofp %8 : i32 to f32
    %10 = vector.broadcast %9 : f32 to vector<16x128xf32>
    %11 = arith.mulf %7, %10 : vector<16x128xf32>
    %cst = arith.constant 0.000000e+00 : f32
    %12 = vector.broadcast %cst : f32 to vector<1x128xf32>
    %13 = tpu.concatenate %12, %11, %12 in 0 : vector<1x128xf32>, vector<16x128xf32>, vector<1x128xf32> -> vector<18x128xf32>
    %cst_4 = arith.constant 0.000000e+00 : f32
    %14 = vector.broadcast %cst_4 : f32 to vector<16x128xf32>
    %15 = vector.extract_strided_slice %13 {offsets = [0, 0], sizes = [16, 128], strides = [1, 1]} : vector<18x128xf32> to vector<16x128xf32>
    %c0_5 = arith.constant 0 : index
    %c0_6 = arith.constant 0 : index
    %c0_7 = arith.constant 0 : index
    %c0_8 = arith.constant 0 : index
    %16 = vector.load %arg4[%c0_5, %c0_6, %c0_7, %c0_8] : memref<1x3x128x128xf32, #tpu.memory_space<vmem>>, vector<1x1x128x128xf32>
    %17 = vector.shape_cast %16 : vector<1x1x128x128xf32> to vector<128x128xf32>
    %cst_9 = arith.constant dense<0.000000e+00> : vector<16x128xf32>
    %18 = tpu.matmul %15, %17, %cst_9 {dimension_numbers = #tpu.dot_dimension_numbers<[1], [0], [0], [1], [0, 0, 1, 1], [], []>} : vector<16x128xf32>, vector<128x128xf32>, vector<16x128xf32> -> vector<16x128xf32>
    %19 = arith.addf %14, %18 : vector<16x128xf32>
    %20 = vector.extract_strided_slice %13 {offsets = [1, 0], sizes = [16, 128], strides = [1, 1]} : vector<18x128xf32> to vector<16x128xf32>
    %c0_10 = arith.constant 0 : index
    %c1 = arith.constant 1 : index
    %c0_11 = arith.constant 0 : index
    %c0_12 = arith.constant 0 : index
    %21 = vector.load %arg4[%c0_10, %c1, %c0_11, %c0_12] : memref<1x3x128x128xf32, #tpu.memory_space<vmem>>, vector<1x1x128x128xf32>
    %22 = vector.shape_cast %21 : vector<1x1x128x128xf32> to vector<128x128xf32>
    %cst_13 = arith.constant dense<0.000000e+00> : vector<16x128xf32>
    %23 = tpu.matmul %20, %22, %cst_13 {dimension_numbers = #tpu.dot_dimension_numbers<[1], [0], [0], [1], [0, 0, 1, 1], [], []>} : vector<16x128xf32>, vector<128x128xf32>, vector<16x128xf32> -> vector<16x128xf32>
    %24 = arith.addf %19, %23 : vector<16x128xf32>
    %25 = vector.extract_strided_slice %13 {offsets = [2, 0], sizes = [16, 128], strides = [1, 1]} : vector<18x128xf32> to vector<16x128xf32>
    %c0_14 = arith.constant 0 : index
    %c2 = arith.constant 2 : index
    %c0_15 = arith.constant 0 : index
    %c0_16 = arith.constant 0 : index
    %26 = vector.load %arg4[%c0_14, %c2, %c0_15, %c0_16] : memref<1x3x128x128xf32, #tpu.memory_space<vmem>>, vector<1x1x128x128xf32>
    %27 = vector.shape_cast %26 : vector<1x1x128x128xf32> to vector<128x128xf32>
    %cst_17 = arith.constant dense<0.000000e+00> : vector<16x128xf32>
    %28 = tpu.matmul %25, %27, %cst_17 {dimension_numbers = #tpu.dot_dimension_numbers<[1], [0], [0], [1], [0, 0, 1, 1], [], []>} : vector<16x128xf32>, vector<128x128xf32>, vector<16x128xf32> -> vector<16x128xf32>
    %29 = arith.addf %24, %28 : vector<16x128xf32>
    %c0_i32_18 = arith.constant 0 : i32
    %30 = arith.cmpi eq, %arg2, %c0_i32_18 : i32
    %31 = arith.extui %30 : i1 to i32
    %c0_i32_19 = arith.constant 0 : i32
    %32 = arith.cmpi ne, %31, %c0_i32_19 : i32
    scf.if %32 {
      %c0_26 = arith.constant 0 : index
      %c0_27 = arith.constant 0 : index
      %c0_28 = arith.constant 0 : index
      %c0_29 = arith.constant 0 : index
      %44 = vector.load %arg6[%c0_26, %c0_27, %c0_28, %c0_29] : memref<1x1x16x128xf32, #tpu.memory_space<vmem>>, vector<1x1x16x128xf32>
      %45 = vector.shape_cast %44 : vector<1x1x16x128xf32> to vector<16x128xf32>
      %46 = vector.shape_cast %29 : vector<16x128xf32> to vector<1x1x16x128xf32>
      tpu.vector_store %arg6[%c0_26, %c0_27, %c0_28, %c0_29], %46 {strides = array<i32>} : memref<1x1x16x128xf32, #tpu.memory_space<vmem>>, vector<1x1x16x128xf32>,
    } else {
    }
    %c0_i32_20 = arith.constant 0 : i32
    %33 = arith.cmpi sgt, %arg2, %c0_i32_20 : i32
    %34 = arith.extui %33 : i1 to i32
    %c0_i32_21 = arith.constant 0 : i32
    %35 = arith.cmpi ne, %34, %c0_i32_21 : i32
    scf.if %35 {
      %c0_26 = arith.constant 0 : index
      %c0_27 = arith.constant 0 : index
      %c0_28 = arith.constant 0 : index
      %c0_29 = arith.constant 0 : index
      %44 = vector.load %arg6[%c0_26, %c0_27, %c0_28, %c0_29] : memref<1x1x16x128xf32, #tpu.memory_space<vmem>>, vector<1x1x16x128xf32>
      %45 = vector.shape_cast %44 : vector<1x1x16x128xf32> to vector<16x128xf32>
      %46 = arith.addf %45, %29 : vector<16x128xf32>
      %c0_30 = arith.constant 0 : index
      %c0_31 = arith.constant 0 : index
      %c0_32 = arith.constant 0 : index
      %c0_33 = arith.constant 0 : index
      %47 = vector.load %arg6[%c0_30, %c0_31, %c0_32, %c0_33] : memref<1x1x16x128xf32, #tpu.memory_space<vmem>>, vector<1x1x16x128xf32>
      %48 = vector.shape_cast %47 : vector<1x1x16x128xf32> to vector<16x128xf32>
      %49 = vector.shape_cast %46 : vector<16x128xf32> to vector<1x1x16x128xf32>
      tpu.vector_store %arg6[%c0_30, %c0_31, %c0_32, %c0_33], %49 {strides = array<i32>} : memref<1x1x16x128xf32, #tpu.memory_space<vmem>>, vector<1x1x16x128xf32>,
    } else {
    }
    %c0_i32_22 = arith.constant 0 : i32
    %36 = arith.cmpi eq, %arg1, %c0_i32_22 : i32
    %c0_i32_23 = arith.constant 0 : i32
    %37 = arith.cmpi eq, %arg2, %c0_i32_23 : i32
    %38 = arith.andi %36, %37 : i1
    %39 = arith.extui %38 : i1 to i32
    %c0_i32_24 = arith.constant 0 : i32
    %40 = arith.cmpi ne, %39, %c0_i32_24 : i32
    scf.if %40 {
      %cst_26 = arith.constant 0.000000e+00 : f32
      %44 = vector.broadcast %cst_26 : f32 to vector<1x1x128xf32>
      %c0_27 = arith.constant 0 : index
      %c0_28 = arith.constant 0 : index
      %c0_29 = arith.constant 0 : index
      %45 = vector.load %arg7[%c0_27, %c0_28, %c0_29] : memref<1x1x128xf32, #tpu.memory_space<vmem>>, vector<1x1x128xf32>
      tpu.vector_store %arg7[%c0_27, %c0_28, %c0_29], %44 {strides = array<i32>} : memref<1x1x128xf32, #tpu.memory_space<vmem>>, vector<1x1x128xf32>,
      %cst_30 = arith.constant 0.000000e+00 : f32
      %46 = vector.broadcast %cst_30 : f32 to vector<1x1x128xf32>
      %c0_31 = arith.constant 0 : index
      %c0_32 = arith.constant 0 : index
      %c0_33 = arith.constant 0 : index
      %47 = vector.load %arg8[%c0_31, %c0_32, %c0_33] : memref<1x1x128xf32, #tpu.memory_space<vmem>>, vector<1x1x128xf32>
      tpu.vector_store %arg8[%c0_31, %c0_32, %c0_33], %46 {strides = array<i32>} : memref<1x1x128xf32, #tpu.memory_space<vmem>>, vector<1x1x128xf32>,
    } else {
    }
    %c2_i32 = arith.constant 2 : i32
    %41 = arith.cmpi eq, %arg2, %c2_i32 : i32
    %42 = arith.extui %41 : i1 to i32
    %c0_i32_25 = arith.constant 0 : i32
    %43 = arith.cmpi ne, %42, %c0_i32_25 : i32
    scf.if %43 {
      %c0_26 = arith.constant 0 : index
      %c0_27 = arith.constant 0 : index
      %c0_28 = arith.constant 0 : index
      %c0_29 = arith.constant 0 : index
      %44 = vector.load %arg6[%c0_26, %c0_27, %c0_28, %c0_29] : memref<1x1x16x128xf32, #tpu.memory_space<vmem>>, vector<1x1x16x128xf32>
      %45 = vector.shape_cast %44 : vector<1x1x16x128xf32> to vector<16x128xf32>
      %c0_30 = arith.constant 0 : index
      %c0_31 = arith.constant 0 : index
      %c0_32 = arith.constant 0 : index
      %46 = vector.load %arg7[%c0_30, %c0_31, %c0_32] : memref<1x1x128xf32, #tpu.memory_space<vmem>>, vector<1x1x128xf32>
      %47 = vector.shape_cast %46 : vector<1x1x128xf32> to vector<1x128xf32>
      %cst_33 = arith.constant dense<0.000000e+00> : vector<128xf32>
      %48 = vector.multi_reduction <add>, %45, %cst_33 [0] : vector<16x128xf32> to vector<128xf32>
      %49 = vector.shape_cast %48 : vector<128xf32> to vector<1x128xf32>
      %50 = arith.addf %47, %49 : vector<1x128xf32>
      %c0_34 = arith.constant 0 : index
      %c0_35 = arith.constant 0 : index
      %c0_36 = arith.constant 0 : index
      %51 = vector.load %arg7[%c0_34, %c0_35, %c0_36] : memref<1x1x128xf32, #tpu.memory_space<vmem>>, vector<1x1x128xf32>
      %52 = vector.shape_cast %51 : vector<1x1x128xf32> to vector<1x128xf32>
      %53 = vector.shape_cast %50 : vector<1x128xf32> to vector<1x1x128xf32>
      tpu.vector_store %arg7[%c0_34, %c0_35, %c0_36], %53 {strides = array<i32>} : memref<1x1x128xf32, #tpu.memory_space<vmem>>, vector<1x1x128xf32>,
      %c0_37 = arith.constant 0 : index
      %c0_38 = arith.constant 0 : index
      %c0_39 = arith.constant 0 : index
      %54 = vector.load %arg8[%c0_37, %c0_38, %c0_39] : memref<1x1x128xf32, #tpu.memory_space<vmem>>, vector<1x1x128xf32>
      %55 = vector.shape_cast %54 : vector<1x1x128xf32> to vector<1x128xf32>
      %56 = arith.mulf %45, %45 : vector<16x128xf32>
      %cst_40 = arith.constant dense<0.000000e+00> : vector<128xf32>
      %57 = vector.multi_reduction <add>, %56, %cst_40 [0] : vector<16x128xf32> to vector<128xf32>
      %58 = vector.shape_cast %57 : vector<128xf32> to vector<1x128xf32>
      %59 = arith.addf %55, %58 : vector<1x128xf32>
      %c0_41 = arith.constant 0 : index
      %c0_42 = arith.constant 0 : index
      %c0_43 = arith.constant 0 : index
      %60 = vector.load %arg8[%c0_41, %c0_42, %c0_43] : memref<1x1x128xf32, #tpu.memory_space<vmem>>, vector<1x1x128xf32>
      %61 = vector.shape_cast %60 : vector<1x1x128xf32> to vector<1x128xf32>
      %62 = vector.shape_cast %59 : vector<1x128xf32> to vector<1x1x128xf32>
      tpu.vector_store %arg8[%c0_41, %c0_42, %c0_43], %62 {strides = array<i32>} : memref<1x1x128xf32, #tpu.memory_space<vmem>>, vector<1x1x128xf32>,
    } else {
    }
    return
  }
  func.func @transform_0(%arg0: i32, %arg1: i32, %arg2: i32) -> (i32, i32, i32, i32) {
    %c1_i32 = arith.constant 1 : i32
    %0 = arith.muli %arg1, %c1_i32 : i32
    %1 = arith.addi %0, %arg2 : i32
    %c1_i32_0 = arith.constant 1 : i32
    %2 = arith.subi %1, %c1_i32_0 : i32
    %c0_i32 = arith.constant 0 : i32
    %c15_i32 = arith.constant 15 : i32
    %3 = arith.maxsi %c0_i32, %2 : i32
    %4 = arith.minsi %c15_i32, %3 : i32
    %c0_i32_1 = arith.constant 0 : i32
    %c0_i32_2 = arith.constant 0 : i32
    %c0_i32_3 = arith.constant 0 : i32
    return %arg0, %4, %c0_i32_1, %c0_i32_2 : i32, i32, i32, i32
  }
  func.func @transform_1(%arg0: i32, %arg1: i32, %arg2: i32) -> (i32, i32, i32, i32) {
    %c0_i32 = arith.constant 0 : i32
    %c0_i32_0 = arith.constant 0 : i32
    %c0_i32_1 = arith.constant 0 : i32
    %c0_i32_2 = arith.constant 0 : i32
    return %arg2, %c0_i32, %c0_i32_0, %c0_i32_1 : i32, i32, i32, i32
  }
  func.func @transform_2(%arg0: i32, %arg1: i32, %arg2: i32) -> (i32, i32) {
    %c0_i32 = arith.constant 0 : i32
    %c0_i32_0 = arith.constant 0 : i32
    %c0_i32_1 = arith.constant 0 : i32
    return %c0_i32, %c0_i32_0 : i32, i32
  }
  func.func @transform_3(%arg0: i32, %arg1: i32, %arg2: i32) -> (i32, i32, i32, i32) {
    %c0_i32 = arith.constant 0 : i32
    %c0_i32_0 = arith.constant 0 : i32
    %c0_i32_1 = arith.constant 0 : i32
    return %arg0, %arg1, %c0_i32, %c0_i32_0 : i32, i32, i32, i32
  }
  func.func @transform_4(%arg0: i32, %arg1: i32, %arg2: i32) -> (i32, i32, i32) {
    %c0_i32 = arith.constant 0 : i32
    %c0_i32_0 = arith.constant 0 : i32
    %c0_i32_1 = arith.constant 0 : i32
    return %arg0, %c0_i32, %c0_i32_0 : i32, i32, i32
  }
  func.func @transform_5(%arg0: i32, %arg1: i32, %arg2: i32) -> (i32, i32, i32) {
    %c0_i32 = arith.constant 0 : i32
    %c0_i32_0 = arith.constant 0 : i32
    %c0_i32_1 = arith.constant 0 : i32
    return %arg0, %c0_i32, %c0_i32_0 : i32, i32, i32
  }
}

module attributes {stable_mosaic.version = 11 : i64} {
  func.func @_conv_bn_stats_kernel(%arg0: i32, %arg1: i32, %arg2: i32, %arg3: memref<1x1x16x128xf32, #tpu.memory_space<vmem>>, %arg4: memref<1x3x128x128xf32, #tpu.memory_space<vmem>>, %arg5: memref<2x128xf32, #tpu.memory_space<vmem>>, %arg6: memref<1x1x16x128xf32, #tpu.memory_space<vmem>>, %arg7: memref<1x1x128xf32, #tpu.memory_space<vmem>>, %arg8: memref<1x1x128xf32, #tpu.memory_space<vmem>>) attributes {dimension_semantics = [#tpu.dimension_semantics<parallel>, #tpu.dimension_semantics<arbitrary>, #tpu.dimension_semantics<arbitrary>], iteration_bounds = array<i64: 2, 16, 3>, scalar_prefetch = 0 : i64, scratch_operands = 0 : i64, tpu.core_type = #tpu.core_type<tc>, window_params = [{transform_indices = @transform_0, window_bounds = array<i64: 1, 1, 16, 128>}, {transform_indices = @transform_1, window_bounds = array<i64: 1, 3, 128, 128>}, {pipeline_mode = #tpu.pipeline_mode<synchronous>, transform_indices = @transform_2, window_bounds = array<i64: 2, 128>}, {transform_indices = @transform_3, window_bounds = array<i64: 1, 1, 16, 128>}, {transform_indices = @transform_4, window_bounds = array<i64: 1, 1, 128>}, {transform_indices = @transform_5, window_bounds = array<i64: 1, 1, 128>}]} {
    %c1_i32 = arith.constant 1 : i32
    %0 = arith.muli %arg1, %c1_i32 : i32
    %1 = arith.addi %0, %arg2 : i32
    %c1_i32_0 = arith.constant 1 : i32
    %2 = arith.subi %1, %c1_i32_0 : i32
    %c0_i32 = arith.constant 0 : i32
    %3 = arith.cmpi sge, %2, %c0_i32 : i32
    %c16_i32 = arith.constant 16 : i32
    %4 = arith.cmpi slt, %2, %c16_i32 : i32
    %5 = arith.andi %3, %4 : i1
    %c0 = arith.constant 0 : index
    %c0_1 = arith.constant 0 : index
    %c0_2 = arith.constant 0 : index
    %c0_3 = arith.constant 0 : index
    %6 = vector.load %arg3[%c0, %c0_1, %c0_2, %c0_3] : memref<1x1x16x128xf32, #tpu.memory_space<vmem>>, vector<1x1x16x128xf32>
    %7 = vector.shape_cast %6 : vector<1x1x16x128xf32> to vector<16x128xf32>
    %c0_4 = arith.constant 0 : index
    %c0_5 = arith.constant 0 : index
    %8 = vector.load %arg5[%c0_4, %c0_5] : memref<2x128xf32, #tpu.memory_space<vmem>>, vector<1x128xf32>
    %9 = vector.broadcast %8 : vector<1x128xf32> to vector<16x128xf32>
    %10 = arith.mulf %7, %9 : vector<16x128xf32>
    %c1 = arith.constant 1 : index
    %c0_6 = arith.constant 0 : index
    %11 = vector.load %arg5[%c1, %c0_6] : memref<2x128xf32, #tpu.memory_space<vmem>>, vector<1x128xf32>
    %12 = vector.broadcast %11 : vector<1x128xf32> to vector<16x128xf32>
    %13 = arith.addf %10, %12 : vector<16x128xf32>
    %cst = arith.constant 0.000000e+00 : f32
    %14 = vector.broadcast %cst : f32 to vector<16x128xf32>
    %15 = arith.maximumf %13, %14 : vector<16x128xf32>
    %16 = arith.extui %5 : i1 to i32
    %17 = arith.sitofp %16 : i32 to f32
    %18 = vector.broadcast %17 : f32 to vector<16x128xf32>
    %19 = arith.mulf %15, %18 : vector<16x128xf32>
    %cst_7 = arith.constant 0.000000e+00 : f32
    %20 = vector.broadcast %cst_7 : f32 to vector<1x128xf32>
    %21 = tpu.concatenate %20, %19, %20 in 0 : vector<1x128xf32>, vector<16x128xf32>, vector<1x128xf32> -> vector<18x128xf32>
    %cst_8 = arith.constant 0.000000e+00 : f32
    %22 = vector.broadcast %cst_8 : f32 to vector<16x128xf32>
    %23 = vector.extract_strided_slice %21 {offsets = [0, 0], sizes = [16, 128], strides = [1, 1]} : vector<18x128xf32> to vector<16x128xf32>
    %c0_9 = arith.constant 0 : index
    %c0_10 = arith.constant 0 : index
    %c0_11 = arith.constant 0 : index
    %c0_12 = arith.constant 0 : index
    %24 = vector.load %arg4[%c0_9, %c0_10, %c0_11, %c0_12] : memref<1x3x128x128xf32, #tpu.memory_space<vmem>>, vector<1x1x128x128xf32>
    %25 = vector.shape_cast %24 : vector<1x1x128x128xf32> to vector<128x128xf32>
    %cst_13 = arith.constant dense<0.000000e+00> : vector<16x128xf32>
    %26 = tpu.matmul %23, %25, %cst_13 {dimension_numbers = #tpu.dot_dimension_numbers<[1], [0], [0], [1], [0, 0, 1, 1], [], []>} : vector<16x128xf32>, vector<128x128xf32>, vector<16x128xf32> -> vector<16x128xf32>
    %27 = arith.addf %22, %26 : vector<16x128xf32>
    %28 = vector.extract_strided_slice %21 {offsets = [1, 0], sizes = [16, 128], strides = [1, 1]} : vector<18x128xf32> to vector<16x128xf32>
    %c0_14 = arith.constant 0 : index
    %c1_15 = arith.constant 1 : index
    %c0_16 = arith.constant 0 : index
    %c0_17 = arith.constant 0 : index
    %29 = vector.load %arg4[%c0_14, %c1_15, %c0_16, %c0_17] : memref<1x3x128x128xf32, #tpu.memory_space<vmem>>, vector<1x1x128x128xf32>
    %30 = vector.shape_cast %29 : vector<1x1x128x128xf32> to vector<128x128xf32>
    %cst_18 = arith.constant dense<0.000000e+00> : vector<16x128xf32>
    %31 = tpu.matmul %28, %30, %cst_18 {dimension_numbers = #tpu.dot_dimension_numbers<[1], [0], [0], [1], [0, 0, 1, 1], [], []>} : vector<16x128xf32>, vector<128x128xf32>, vector<16x128xf32> -> vector<16x128xf32>
    %32 = arith.addf %27, %31 : vector<16x128xf32>
    %33 = vector.extract_strided_slice %21 {offsets = [2, 0], sizes = [16, 128], strides = [1, 1]} : vector<18x128xf32> to vector<16x128xf32>
    %c0_19 = arith.constant 0 : index
    %c2 = arith.constant 2 : index
    %c0_20 = arith.constant 0 : index
    %c0_21 = arith.constant 0 : index
    %34 = vector.load %arg4[%c0_19, %c2, %c0_20, %c0_21] : memref<1x3x128x128xf32, #tpu.memory_space<vmem>>, vector<1x1x128x128xf32>
    %35 = vector.shape_cast %34 : vector<1x1x128x128xf32> to vector<128x128xf32>
    %cst_22 = arith.constant dense<0.000000e+00> : vector<16x128xf32>
    %36 = tpu.matmul %33, %35, %cst_22 {dimension_numbers = #tpu.dot_dimension_numbers<[1], [0], [0], [1], [0, 0, 1, 1], [], []>} : vector<16x128xf32>, vector<128x128xf32>, vector<16x128xf32> -> vector<16x128xf32>
    %37 = arith.addf %32, %36 : vector<16x128xf32>
    %c0_i32_23 = arith.constant 0 : i32
    %38 = arith.cmpi eq, %arg2, %c0_i32_23 : i32
    %39 = arith.extui %38 : i1 to i32
    %c0_i32_24 = arith.constant 0 : i32
    %40 = arith.cmpi ne, %39, %c0_i32_24 : i32
    scf.if %40 {
      %c0_31 = arith.constant 0 : index
      %c0_32 = arith.constant 0 : index
      %c0_33 = arith.constant 0 : index
      %c0_34 = arith.constant 0 : index
      %52 = vector.load %arg6[%c0_31, %c0_32, %c0_33, %c0_34] : memref<1x1x16x128xf32, #tpu.memory_space<vmem>>, vector<1x1x16x128xf32>
      %53 = vector.shape_cast %52 : vector<1x1x16x128xf32> to vector<16x128xf32>
      %54 = vector.shape_cast %37 : vector<16x128xf32> to vector<1x1x16x128xf32>
      tpu.vector_store %arg6[%c0_31, %c0_32, %c0_33, %c0_34], %54 {strides = array<i32>} : memref<1x1x16x128xf32, #tpu.memory_space<vmem>>, vector<1x1x16x128xf32>,
    } else {
    }
    %c0_i32_25 = arith.constant 0 : i32
    %41 = arith.cmpi sgt, %arg2, %c0_i32_25 : i32
    %42 = arith.extui %41 : i1 to i32
    %c0_i32_26 = arith.constant 0 : i32
    %43 = arith.cmpi ne, %42, %c0_i32_26 : i32
    scf.if %43 {
      %c0_31 = arith.constant 0 : index
      %c0_32 = arith.constant 0 : index
      %c0_33 = arith.constant 0 : index
      %c0_34 = arith.constant 0 : index
      %52 = vector.load %arg6[%c0_31, %c0_32, %c0_33, %c0_34] : memref<1x1x16x128xf32, #tpu.memory_space<vmem>>, vector<1x1x16x128xf32>
      %53 = vector.shape_cast %52 : vector<1x1x16x128xf32> to vector<16x128xf32>
      %54 = arith.addf %53, %37 : vector<16x128xf32>
      %c0_35 = arith.constant 0 : index
      %c0_36 = arith.constant 0 : index
      %c0_37 = arith.constant 0 : index
      %c0_38 = arith.constant 0 : index
      %55 = vector.load %arg6[%c0_35, %c0_36, %c0_37, %c0_38] : memref<1x1x16x128xf32, #tpu.memory_space<vmem>>, vector<1x1x16x128xf32>
      %56 = vector.shape_cast %55 : vector<1x1x16x128xf32> to vector<16x128xf32>
      %57 = vector.shape_cast %54 : vector<16x128xf32> to vector<1x1x16x128xf32>
      tpu.vector_store %arg6[%c0_35, %c0_36, %c0_37, %c0_38], %57 {strides = array<i32>} : memref<1x1x16x128xf32, #tpu.memory_space<vmem>>, vector<1x1x16x128xf32>,
    } else {
    }
    %c0_i32_27 = arith.constant 0 : i32
    %44 = arith.cmpi eq, %arg1, %c0_i32_27 : i32
    %c0_i32_28 = arith.constant 0 : i32
    %45 = arith.cmpi eq, %arg2, %c0_i32_28 : i32
    %46 = arith.andi %44, %45 : i1
    %47 = arith.extui %46 : i1 to i32
    %c0_i32_29 = arith.constant 0 : i32
    %48 = arith.cmpi ne, %47, %c0_i32_29 : i32
    scf.if %48 {
      %cst_31 = arith.constant 0.000000e+00 : f32
      %52 = vector.broadcast %cst_31 : f32 to vector<1x1x128xf32>
      %c0_32 = arith.constant 0 : index
      %c0_33 = arith.constant 0 : index
      %c0_34 = arith.constant 0 : index
      %53 = vector.load %arg7[%c0_32, %c0_33, %c0_34] : memref<1x1x128xf32, #tpu.memory_space<vmem>>, vector<1x1x128xf32>
      tpu.vector_store %arg7[%c0_32, %c0_33, %c0_34], %52 {strides = array<i32>} : memref<1x1x128xf32, #tpu.memory_space<vmem>>, vector<1x1x128xf32>,
      %cst_35 = arith.constant 0.000000e+00 : f32
      %54 = vector.broadcast %cst_35 : f32 to vector<1x1x128xf32>
      %c0_36 = arith.constant 0 : index
      %c0_37 = arith.constant 0 : index
      %c0_38 = arith.constant 0 : index
      %55 = vector.load %arg8[%c0_36, %c0_37, %c0_38] : memref<1x1x128xf32, #tpu.memory_space<vmem>>, vector<1x1x128xf32>
      tpu.vector_store %arg8[%c0_36, %c0_37, %c0_38], %54 {strides = array<i32>} : memref<1x1x128xf32, #tpu.memory_space<vmem>>, vector<1x1x128xf32>,
    } else {
    }
    %c2_i32 = arith.constant 2 : i32
    %49 = arith.cmpi eq, %arg2, %c2_i32 : i32
    %50 = arith.extui %49 : i1 to i32
    %c0_i32_30 = arith.constant 0 : i32
    %51 = arith.cmpi ne, %50, %c0_i32_30 : i32
    scf.if %51 {
      %c0_31 = arith.constant 0 : index
      %c0_32 = arith.constant 0 : index
      %c0_33 = arith.constant 0 : index
      %c0_34 = arith.constant 0 : index
      %52 = vector.load %arg6[%c0_31, %c0_32, %c0_33, %c0_34] : memref<1x1x16x128xf32, #tpu.memory_space<vmem>>, vector<1x1x16x128xf32>
      %53 = vector.shape_cast %52 : vector<1x1x16x128xf32> to vector<16x128xf32>
      %c0_35 = arith.constant 0 : index
      %c0_36 = arith.constant 0 : index
      %c0_37 = arith.constant 0 : index
      %54 = vector.load %arg7[%c0_35, %c0_36, %c0_37] : memref<1x1x128xf32, #tpu.memory_space<vmem>>, vector<1x1x128xf32>
      %55 = vector.shape_cast %54 : vector<1x1x128xf32> to vector<1x128xf32>
      %cst_38 = arith.constant dense<0.000000e+00> : vector<128xf32>
      %56 = vector.multi_reduction <add>, %53, %cst_38 [0] : vector<16x128xf32> to vector<128xf32>
      %57 = vector.shape_cast %56 : vector<128xf32> to vector<1x128xf32>
      %58 = arith.addf %55, %57 : vector<1x128xf32>
      %c0_39 = arith.constant 0 : index
      %c0_40 = arith.constant 0 : index
      %c0_41 = arith.constant 0 : index
      %59 = vector.load %arg7[%c0_39, %c0_40, %c0_41] : memref<1x1x128xf32, #tpu.memory_space<vmem>>, vector<1x1x128xf32>
      %60 = vector.shape_cast %59 : vector<1x1x128xf32> to vector<1x128xf32>
      %61 = vector.shape_cast %58 : vector<1x128xf32> to vector<1x1x128xf32>
      tpu.vector_store %arg7[%c0_39, %c0_40, %c0_41], %61 {strides = array<i32>} : memref<1x1x128xf32, #tpu.memory_space<vmem>>, vector<1x1x128xf32>,
      %c0_42 = arith.constant 0 : index
      %c0_43 = arith.constant 0 : index
      %c0_44 = arith.constant 0 : index
      %62 = vector.load %arg8[%c0_42, %c0_43, %c0_44] : memref<1x1x128xf32, #tpu.memory_space<vmem>>, vector<1x1x128xf32>
      %63 = vector.shape_cast %62 : vector<1x1x128xf32> to vector<1x128xf32>
      %64 = arith.mulf %53, %53 : vector<16x128xf32>
      %cst_45 = arith.constant dense<0.000000e+00> : vector<128xf32>
      %65 = vector.multi_reduction <add>, %64, %cst_45 [0] : vector<16x128xf32> to vector<128xf32>
      %66 = vector.shape_cast %65 : vector<128xf32> to vector<1x128xf32>
      %67 = arith.addf %63, %66 : vector<1x128xf32>
      %c0_46 = arith.constant 0 : index
      %c0_47 = arith.constant 0 : index
      %c0_48 = arith.constant 0 : index
      %68 = vector.load %arg8[%c0_46, %c0_47, %c0_48] : memref<1x1x128xf32, #tpu.memory_space<vmem>>, vector<1x1x128xf32>
      %69 = vector.shape_cast %68 : vector<1x1x128xf32> to vector<1x128xf32>
      %70 = vector.shape_cast %67 : vector<1x128xf32> to vector<1x1x128xf32>
      tpu.vector_store %arg8[%c0_46, %c0_47, %c0_48], %70 {strides = array<i32>} : memref<1x1x128xf32, #tpu.memory_space<vmem>>, vector<1x1x128xf32>,
    } else {
    }
    return
  }
  func.func @transform_0(%arg0: i32, %arg1: i32, %arg2: i32) -> (i32, i32, i32, i32) {
    %c1_i32 = arith.constant 1 : i32
    %0 = arith.muli %arg1, %c1_i32 : i32
    %1 = arith.addi %0, %arg2 : i32
    %c1_i32_0 = arith.constant 1 : i32
    %2 = arith.subi %1, %c1_i32_0 : i32
    %c0_i32 = arith.constant 0 : i32
    %c15_i32 = arith.constant 15 : i32
    %3 = arith.maxsi %c0_i32, %2 : i32
    %4 = arith.minsi %c15_i32, %3 : i32
    %c0_i32_1 = arith.constant 0 : i32
    %c0_i32_2 = arith.constant 0 : i32
    %c0_i32_3 = arith.constant 0 : i32
    return %arg0, %4, %c0_i32_1, %c0_i32_2 : i32, i32, i32, i32
  }
  func.func @transform_1(%arg0: i32, %arg1: i32, %arg2: i32) -> (i32, i32, i32, i32) {
    %c0_i32 = arith.constant 0 : i32
    %c0_i32_0 = arith.constant 0 : i32
    %c0_i32_1 = arith.constant 0 : i32
    %c0_i32_2 = arith.constant 0 : i32
    return %arg2, %c0_i32, %c0_i32_0, %c0_i32_1 : i32, i32, i32, i32
  }
  func.func @transform_2(%arg0: i32, %arg1: i32, %arg2: i32) -> (i32, i32) {
    %c0_i32 = arith.constant 0 : i32
    %c0_i32_0 = arith.constant 0 : i32
    %c0_i32_1 = arith.constant 0 : i32
    return %c0_i32, %c0_i32_0 : i32, i32
  }
  func.func @transform_3(%arg0: i32, %arg1: i32, %arg2: i32) -> (i32, i32, i32, i32) {
    %c0_i32 = arith.constant 0 : i32
    %c0_i32_0 = arith.constant 0 : i32
    %c0_i32_1 = arith.constant 0 : i32
    return %arg0, %arg1, %c0_i32, %c0_i32_0 : i32, i32, i32, i32
  }
  func.func @transform_4(%arg0: i32, %arg1: i32, %arg2: i32) -> (i32, i32, i32) {
    %c0_i32 = arith.constant 0 : i32
    %c0_i32_0 = arith.constant 0 : i32
    %c0_i32_1 = arith.constant 0 : i32
    return %arg0, %c0_i32, %c0_i32_0 : i32, i32, i32
  }
  func.func @transform_5(%arg0: i32, %arg1: i32, %arg2: i32) -> (i32, i32, i32) {
    %c0_i32 = arith.constant 0 : i32
    %c0_i32_0 = arith.constant 0 : i32
    %c0_i32_1 = arith.constant 0 : i32
    return %arg0, %c0_i32, %c0_i32_0 : i32, i32, i32
  }
}

module attributes {stable_mosaic.version = 11 : i64} {
  func.func @_bn_add_relu_kernel(%arg0: i32, %arg1: memref<512x128xf32, #tpu.memory_space<vmem>>, %arg2: memref<2x128xf32, #tpu.memory_space<vmem>>, %arg3: memref<512x128xf32, #tpu.memory_space<vmem>>, %arg4: memref<2x128xf32, #tpu.memory_space<vmem>>, %arg5: memref<512x128xf32, #tpu.memory_space<vmem>>) attributes {dimension_semantics = [#tpu.dimension_semantics<parallel>], iteration_bounds = array<i64: 1>, scalar_prefetch = 0 : i64, scratch_operands = 0 : i64, tpu.core_type = #tpu.core_type<tc>, window_params = [{transform_indices = @transform_0, window_bounds = array<i64: 512, 128>}, {pipeline_mode = #tpu.pipeline_mode<synchronous>, transform_indices = @transform_1, window_bounds = array<i64: 2, 128>}, {transform_indices = @transform_2, window_bounds = array<i64: 512, 128>}, {pipeline_mode = #tpu.pipeline_mode<synchronous>, transform_indices = @transform_3, window_bounds = array<i64: 2, 128>}, {transform_indices = @transform_4, window_bounds = array<i64: 512, 128>}]} {
    %c0 = arith.constant 0 : index
    %c0_0 = arith.constant 0 : index
    %0 = vector.load %arg1[%c0, %c0_0] : memref<512x128xf32, #tpu.memory_space<vmem>>, vector<512x128xf32>
    %c0_1 = arith.constant 0 : index
    %c0_2 = arith.constant 0 : index
    %1 = vector.load %arg2[%c0_1, %c0_2] : memref<2x128xf32, #tpu.memory_space<vmem>>, vector<1x128xf32>
    %2 = vector.broadcast %1 : vector<1x128xf32> to vector<512x128xf32>
    %3 = arith.mulf %0, %2 : vector<512x128xf32>
    %c1 = arith.constant 1 : index
    %c0_3 = arith.constant 0 : index
    %4 = vector.load %arg2[%c1, %c0_3] : memref<2x128xf32, #tpu.memory_space<vmem>>, vector<1x128xf32>
    %5 = vector.broadcast %4 : vector<1x128xf32> to vector<512x128xf32>
    %6 = arith.addf %3, %5 : vector<512x128xf32>
    %c0_4 = arith.constant 0 : index
    %c0_5 = arith.constant 0 : index
    %7 = vector.load %arg3[%c0_4, %c0_5] : memref<512x128xf32, #tpu.memory_space<vmem>>, vector<512x128xf32>
    %c0_6 = arith.constant 0 : index
    %c0_7 = arith.constant 0 : index
    %8 = vector.load %arg4[%c0_6, %c0_7] : memref<2x128xf32, #tpu.memory_space<vmem>>, vector<1x128xf32>
    %9 = vector.broadcast %8 : vector<1x128xf32> to vector<512x128xf32>
    %10 = arith.mulf %7, %9 : vector<512x128xf32>
    %11 = arith.addf %6, %10 : vector<512x128xf32>
    %c1_8 = arith.constant 1 : index
    %c0_9 = arith.constant 0 : index
    %12 = vector.load %arg4[%c1_8, %c0_9] : memref<2x128xf32, #tpu.memory_space<vmem>>, vector<1x128xf32>
    %13 = vector.broadcast %12 : vector<1x128xf32> to vector<512x128xf32>
    %14 = arith.addf %11, %13 : vector<512x128xf32>
    %cst = arith.constant 0.000000e+00 : f32
    %15 = vector.broadcast %cst : f32 to vector<512x128xf32>
    %16 = arith.maximumf %14, %15 : vector<512x128xf32>
    %c0_10 = arith.constant 0 : index
    %c0_11 = arith.constant 0 : index
    %17 = vector.load %arg5[%c0_10, %c0_11] : memref<512x128xf32, #tpu.memory_space<vmem>>, vector<512x128xf32>
    tpu.vector_store %arg5[%c0_10, %c0_11], %16 {strides = array<i32>} : memref<512x128xf32, #tpu.memory_space<vmem>>, vector<512x128xf32>,
    return
  }
  func.func @transform_0(%arg0: i32) -> (i32, i32) {
    %c0_i32 = arith.constant 0 : i32
    %c0_i32_0 = arith.constant 0 : i32
    return %arg0, %c0_i32 : i32, i32
  }
  func.func @transform_1(%arg0: i32) -> (i32, i32) {
    %c0_i32 = arith.constant 0 : i32
    %c0_i32_0 = arith.constant 0 : i32
    %c0_i32_1 = arith.constant 0 : i32
    return %c0_i32, %c0_i32_0 : i32, i32
  }
  func.func @transform_2(%arg0: i32) -> (i32, i32) {
    %c0_i32 = arith.constant 0 : i32
    %c0_i32_0 = arith.constant 0 : i32
    return %arg0, %c0_i32 : i32, i32
  }
  func.func @transform_3(%arg0: i32) -> (i32, i32) {
    %c0_i32 = arith.constant 0 : i32
    %c0_i32_0 = arith.constant 0 : i32
    %c0_i32_1 = arith.constant 0 : i32
    return %c0_i32, %c0_i32_0 : i32, i32
  }
  func.func @transform_4(%arg0: i32) -> (i32, i32) {
    %c0_i32 = arith.constant 0 : i32
    %c0_i32_0 = arith.constant 0 : i32
    return %arg0, %c0_i32 : i32, i32
  }
}

module attributes {stable_mosaic.version = 11 : i64} {
  func.func @_conv_bn_stats_kernel(%arg0: i32, %arg1: i32, %arg2: i32, %arg3: memref<1x1x16x128xf32, #tpu.memory_space<vmem>>, %arg4: memref<1x1x128x128xf32, #tpu.memory_space<vmem>>, %arg5: memref<2x128xf32, #tpu.memory_space<vmem>>, %arg6: memref<1x1x16x128xf32, #tpu.memory_space<vmem>>, %arg7: memref<1x1x128xf32, #tpu.memory_space<vmem>>, %arg8: memref<1x1x128xf32, #tpu.memory_space<vmem>>) attributes {dimension_semantics = [#tpu.dimension_semantics<parallel>, #tpu.dimension_semantics<arbitrary>, #tpu.dimension_semantics<arbitrary>], iteration_bounds = array<i64: 2, 16, 1>, scalar_prefetch = 0 : i64, scratch_operands = 0 : i64, tpu.core_type = #tpu.core_type<tc>, window_params = [{transform_indices = @transform_0, window_bounds = array<i64: 1, 1, 16, 128>}, {transform_indices = @transform_1, window_bounds = array<i64: 1, 1, 128, 128>}, {pipeline_mode = #tpu.pipeline_mode<synchronous>, transform_indices = @transform_2, window_bounds = array<i64: 2, 128>}, {transform_indices = @transform_3, window_bounds = array<i64: 1, 1, 16, 128>}, {transform_indices = @transform_4, window_bounds = array<i64: 1, 1, 128>}, {transform_indices = @transform_5, window_bounds = array<i64: 1, 1, 128>}]} {
    %c1_i32 = arith.constant 1 : i32
    %0 = arith.muli %arg1, %c1_i32 : i32
    %1 = arith.addi %0, %arg2 : i32
    %c0_i32 = arith.constant 0 : i32
    %2 = arith.subi %1, %c0_i32 : i32
    %c0_i32_0 = arith.constant 0 : i32
    %3 = arith.cmpi sge, %2, %c0_i32_0 : i32
    %c16_i32 = arith.constant 16 : i32
    %4 = arith.cmpi slt, %2, %c16_i32 : i32
    %5 = arith.andi %3, %4 : i1
    %c0 = arith.constant 0 : index
    %c0_1 = arith.constant 0 : index
    %c0_2 = arith.constant 0 : index
    %c0_3 = arith.constant 0 : index
    %6 = vector.load %arg3[%c0, %c0_1, %c0_2, %c0_3] : memref<1x1x16x128xf32, #tpu.memory_space<vmem>>, vector<1x1x16x128xf32>
    %7 = vector.shape_cast %6 : vector<1x1x16x128xf32> to vector<16x128xf32>
    %8 = arith.extui %5 : i1 to i32
    %9 = arith.sitofp %8 : i32 to f32
    %10 = vector.broadcast %9 : f32 to vector<16x128xf32>
    %11 = arith.mulf %7, %10 : vector<16x128xf32>
    %cst = arith.constant 0.000000e+00 : f32
    %12 = vector.broadcast %cst : f32 to vector<16x128xf32>
    %13 = vector.extract_strided_slice %11 {offsets = [0, 0], sizes = [16, 128], strides = [1, 1]} : vector<16x128xf32> to vector<16x128xf32>
    %c0_4 = arith.constant 0 : index
    %c0_5 = arith.constant 0 : index
    %c0_6 = arith.constant 0 : index
    %c0_7 = arith.constant 0 : index
    %14 = vector.load %arg4[%c0_4, %c0_5, %c0_6, %c0_7] : memref<1x1x128x128xf32, #tpu.memory_space<vmem>>, vector<1x1x128x128xf32>
    %15 = vector.shape_cast %14 : vector<1x1x128x128xf32> to vector<128x128xf32>
    %cst_8 = arith.constant dense<0.000000e+00> : vector<16x128xf32>
    %16 = tpu.matmul %13, %15, %cst_8 {dimension_numbers = #tpu.dot_dimension_numbers<[1], [0], [0], [1], [0, 0, 1, 1], [], []>} : vector<16x128xf32>, vector<128x128xf32>, vector<16x128xf32> -> vector<16x128xf32>
    %17 = arith.addf %12, %16 : vector<16x128xf32>
    %c0_i32_9 = arith.constant 0 : i32
    %18 = arith.cmpi eq, %arg2, %c0_i32_9 : i32
    %19 = arith.extui %18 : i1 to i32
    %c0_i32_10 = arith.constant 0 : i32
    %20 = arith.cmpi ne, %19, %c0_i32_10 : i32
    scf.if %20 {
      %c0_18 = arith.constant 0 : index
      %c0_19 = arith.constant 0 : index
      %c0_20 = arith.constant 0 : index
      %c0_21 = arith.constant 0 : index
      %32 = vector.load %arg6[%c0_18, %c0_19, %c0_20, %c0_21] : memref<1x1x16x128xf32, #tpu.memory_space<vmem>>, vector<1x1x16x128xf32>
      %33 = vector.shape_cast %32 : vector<1x1x16x128xf32> to vector<16x128xf32>
      %34 = vector.shape_cast %17 : vector<16x128xf32> to vector<1x1x16x128xf32>
      tpu.vector_store %arg6[%c0_18, %c0_19, %c0_20, %c0_21], %34 {strides = array<i32>} : memref<1x1x16x128xf32, #tpu.memory_space<vmem>>, vector<1x1x16x128xf32>,
    } else {
    }
    %c0_i32_11 = arith.constant 0 : i32
    %21 = arith.cmpi sgt, %arg2, %c0_i32_11 : i32
    %22 = arith.extui %21 : i1 to i32
    %c0_i32_12 = arith.constant 0 : i32
    %23 = arith.cmpi ne, %22, %c0_i32_12 : i32
    scf.if %23 {
      %c0_18 = arith.constant 0 : index
      %c0_19 = arith.constant 0 : index
      %c0_20 = arith.constant 0 : index
      %c0_21 = arith.constant 0 : index
      %32 = vector.load %arg6[%c0_18, %c0_19, %c0_20, %c0_21] : memref<1x1x16x128xf32, #tpu.memory_space<vmem>>, vector<1x1x16x128xf32>
      %33 = vector.shape_cast %32 : vector<1x1x16x128xf32> to vector<16x128xf32>
      %34 = arith.addf %33, %17 : vector<16x128xf32>
      %c0_22 = arith.constant 0 : index
      %c0_23 = arith.constant 0 : index
      %c0_24 = arith.constant 0 : index
      %c0_25 = arith.constant 0 : index
      %35 = vector.load %arg6[%c0_22, %c0_23, %c0_24, %c0_25] : memref<1x1x16x128xf32, #tpu.memory_space<vmem>>, vector<1x1x16x128xf32>
      %36 = vector.shape_cast %35 : vector<1x1x16x128xf32> to vector<16x128xf32>
      %37 = vector.shape_cast %34 : vector<16x128xf32> to vector<1x1x16x128xf32>
      tpu.vector_store %arg6[%c0_22, %c0_23, %c0_24, %c0_25], %37 {strides = array<i32>} : memref<1x1x16x128xf32, #tpu.memory_space<vmem>>, vector<1x1x16x128xf32>,
    } else {
    }
    %c0_i32_13 = arith.constant 0 : i32
    %24 = arith.cmpi eq, %arg1, %c0_i32_13 : i32
    %c0_i32_14 = arith.constant 0 : i32
    %25 = arith.cmpi eq, %arg2, %c0_i32_14 : i32
    %26 = arith.andi %24, %25 : i1
    %27 = arith.extui %26 : i1 to i32
    %c0_i32_15 = arith.constant 0 : i32
    %28 = arith.cmpi ne, %27, %c0_i32_15 : i32
    scf.if %28 {
      %cst_18 = arith.constant 0.000000e+00 : f32
      %32 = vector.broadcast %cst_18 : f32 to vector<1x1x128xf32>
      %c0_19 = arith.constant 0 : index
      %c0_20 = arith.constant 0 : index
      %c0_21 = arith.constant 0 : index
      %33 = vector.load %arg7[%c0_19, %c0_20, %c0_21] : memref<1x1x128xf32, #tpu.memory_space<vmem>>, vector<1x1x128xf32>
      tpu.vector_store %arg7[%c0_19, %c0_20, %c0_21], %32 {strides = array<i32>} : memref<1x1x128xf32, #tpu.memory_space<vmem>>, vector<1x1x128xf32>,
      %cst_22 = arith.constant 0.000000e+00 : f32
      %34 = vector.broadcast %cst_22 : f32 to vector<1x1x128xf32>
      %c0_23 = arith.constant 0 : index
      %c0_24 = arith.constant 0 : index
      %c0_25 = arith.constant 0 : index
      %35 = vector.load %arg8[%c0_23, %c0_24, %c0_25] : memref<1x1x128xf32, #tpu.memory_space<vmem>>, vector<1x1x128xf32>
      tpu.vector_store %arg8[%c0_23, %c0_24, %c0_25], %34 {strides = array<i32>} : memref<1x1x128xf32, #tpu.memory_space<vmem>>, vector<1x1x128xf32>,
    } else {
    }
    %c0_i32_16 = arith.constant 0 : i32
    %29 = arith.cmpi eq, %arg2, %c0_i32_16 : i32
    %30 = arith.extui %29 : i1 to i32
    %c0_i32_17 = arith.constant 0 : i32
    %31 = arith.cmpi ne, %30, %c0_i32_17 : i32
    scf.if %31 {
      %c0_18 = arith.constant 0 : index
      %c0_19 = arith.constant 0 : index
      %c0_20 = arith.constant 0 : index
      %c0_21 = arith.constant 0 : index
      %32 = vector.load %arg6[%c0_18, %c0_19, %c0_20, %c0_21] : memref<1x1x16x128xf32, #tpu.memory_space<vmem>>, vector<1x1x16x128xf32>
      %33 = vector.shape_cast %32 : vector<1x1x16x128xf32> to vector<16x128xf32>
      %c0_22 = arith.constant 0 : index
      %c0_23 = arith.constant 0 : index
      %c0_24 = arith.constant 0 : index
      %34 = vector.load %arg7[%c0_22, %c0_23, %c0_24] : memref<1x1x128xf32, #tpu.memory_space<vmem>>, vector<1x1x128xf32>
      %35 = vector.shape_cast %34 : vector<1x1x128xf32> to vector<1x128xf32>
      %cst_25 = arith.constant dense<0.000000e+00> : vector<128xf32>
      %36 = vector.multi_reduction <add>, %33, %cst_25 [0] : vector<16x128xf32> to vector<128xf32>
      %37 = vector.shape_cast %36 : vector<128xf32> to vector<1x128xf32>
      %38 = arith.addf %35, %37 : vector<1x128xf32>
      %c0_26 = arith.constant 0 : index
      %c0_27 = arith.constant 0 : index
      %c0_28 = arith.constant 0 : index
      %39 = vector.load %arg7[%c0_26, %c0_27, %c0_28] : memref<1x1x128xf32, #tpu.memory_space<vmem>>, vector<1x1x128xf32>
      %40 = vector.shape_cast %39 : vector<1x1x128xf32> to vector<1x128xf32>
      %41 = vector.shape_cast %38 : vector<1x128xf32> to vector<1x1x128xf32>
      tpu.vector_store %arg7[%c0_26, %c0_27, %c0_28], %41 {strides = array<i32>} : memref<1x1x128xf32, #tpu.memory_space<vmem>>, vector<1x1x128xf32>,
      %c0_29 = arith.constant 0 : index
      %c0_30 = arith.constant 0 : index
      %c0_31 = arith.constant 0 : index
      %42 = vector.load %arg8[%c0_29, %c0_30, %c0_31] : memref<1x1x128xf32, #tpu.memory_space<vmem>>, vector<1x1x128xf32>
      %43 = vector.shape_cast %42 : vector<1x1x128xf32> to vector<1x128xf32>
      %44 = arith.mulf %33, %33 : vector<16x128xf32>
      %cst_32 = arith.constant dense<0.000000e+00> : vector<128xf32>
      %45 = vector.multi_reduction <add>, %44, %cst_32 [0] : vector<16x128xf32> to vector<128xf32>
      %46 = vector.shape_cast %45 : vector<128xf32> to vector<1x128xf32>
      %47 = arith.addf %43, %46 : vector<1x128xf32>
      %c0_33 = arith.constant 0 : index
      %c0_34 = arith.constant 0 : index
      %c0_35 = arith.constant 0 : index
      %48 = vector.load %arg8[%c0_33, %c0_34, %c0_35] : memref<1x1x128xf32, #tpu.memory_space<vmem>>, vector<1x1x128xf32>
      %49 = vector.shape_cast %48 : vector<1x1x128xf32> to vector<1x128xf32>
      %50 = vector.shape_cast %47 : vector<1x128xf32> to vector<1x1x128xf32>
      tpu.vector_store %arg8[%c0_33, %c0_34, %c0_35], %50 {strides = array<i32>} : memref<1x1x128xf32, #tpu.memory_space<vmem>>, vector<1x1x128xf32>,
    } else {
    }
    return
  }
  func.func @transform_0(%arg0: i32, %arg1: i32, %arg2: i32) -> (i32, i32, i32, i32) {
    %c1_i32 = arith.constant 1 : i32
    %0 = arith.muli %arg1, %c1_i32 : i32
    %1 = arith.addi %0, %arg2 : i32
    %c0_i32 = arith.constant 0 : i32
    %2 = arith.subi %1, %c0_i32 : i32
    %c0_i32_0 = arith.constant 0 : i32
    %c15_i32 = arith.constant 15 : i32
    %3 = arith.maxsi %c0_i32_0, %2 : i32
    %4 = arith.minsi %c15_i32, %3 : i32
    %c0_i32_1 = arith.constant 0 : i32
    %c0_i32_2 = arith.constant 0 : i32
    %c0_i32_3 = arith.constant 0 : i32
    return %arg0, %4, %c0_i32_1, %c0_i32_2 : i32, i32, i32, i32
  }
  func.func @transform_1(%arg0: i32, %arg1: i32, %arg2: i32) -> (i32, i32, i32, i32) {
    %c0_i32 = arith.constant 0 : i32
    %c0_i32_0 = arith.constant 0 : i32
    %c0_i32_1 = arith.constant 0 : i32
    %c0_i32_2 = arith.constant 0 : i32
    return %arg2, %c0_i32, %c0_i32_0, %c0_i32_1 : i32, i32, i32, i32
  }
  func.func @transform_2(%arg0: i32, %arg1: i32, %arg2: i32) -> (i32, i32) {
    %c0_i32 = arith.constant 0 : i32
    %c0_i32_0 = arith.constant 0 : i32
    %c0_i32_1 = arith.constant 0 : i32
    return %c0_i32, %c0_i32_0 : i32, i32
  }
  func.func @transform_3(%arg0: i32, %arg1: i32, %arg2: i32) -> (i32, i32, i32, i32) {
    %c0_i32 = arith.constant 0 : i32
    %c0_i32_0 = arith.constant 0 : i32
    %c0_i32_1 = arith.constant 0 : i32
    return %arg0, %arg1, %c0_i32, %c0_i32_0 : i32, i32, i32, i32
  }
  func.func @transform_4(%arg0: i32, %arg1: i32, %arg2: i32) -> (i32, i32, i32) {
    %c0_i32 = arith.constant 0 : i32
    %c0_i32_0 = arith.constant 0 : i32
    %c0_i32_1 = arith.constant 0 : i32
    return %arg0, %c0_i32, %c0_i32_0 : i32, i32, i32
  }
  func.func @transform_5(%arg0: i32, %arg1: i32, %arg2: i32) -> (i32, i32, i32) {
    %c0_i32 = arith.constant 0 : i32
    %c0_i32_0 = arith.constant 0 : i32
    %c0_i32_1 = arith.constant 0 : i32
    return %arg0, %c0_i32, %c0_i32_0 : i32, i32, i32
  }
}

</mosaic_0001>

<bundles_post_ra>
// kernel: residual_block_forward.5
= control target key start
LH: loop header
LB: loop body
LE: loop exit
PB: predicated region body
PF: predicated region fallthrough
CT: control target
= control target key end

     0   :  { %s1379_s18 = smov 0   ;;  %s1381_s19 = smov 0   ;;  %s1593_s0 = inlined_call_operand.vmem [shape: f32[2,16,16,128], index: 0, kind: input, shape index: {}]   ;;  %s1594_s1 = inlined_call_operand.vmem [shape: f32[3,3,128,128], index: 1, kind: input, shape index: {}]   ;;  %s1595_s2 = inlined_call_operand.vmem [shape: f32[2,128], index: 2, kind: input, shape index: {}]   ;;  %s1596_s3 = inlined_call_operand.vmem [shape: f32[2,16,16,128], index: 3, kind: output, shape index: {0}]   ;;  %s1597_s4 = inlined_call_operand.vmem [shape: f32[2,1,128], index: 4, kind: output, shape index: {1}]   ;;  %s1598_s5 = inlined_call_operand.vmem [shape: f32[2,1,128], index: 5, kind: output, shape index: {2}]  }
   0x1   :  { %1599 = sst [smem:[#allocation2_spill]] %s1594_s1  ;;  %s1383_s20 = smov 0  }
   0x2   :  { %s1385_s21 = smov 0   ;;  %s1387_s22 = smov 0  }
   0x3   :  { %s1389_s23 = smov 0   ;;  %s1391_s24 = smov 0  }
   0x4 LB: > { %s28_s25 = sadd.s32 1, %s1334_s21  ;;  %s31_s26 = sadd.s32 1, %s1338_s22  ;;  %s1346_s24 = sphi %s1391_s24, %s16_s24   ;;  %s1342_s23 = sphi %s1389_s23, %s1607_s23   ;;  %s1338_s22 = sphi %s1387_s22, %s1606_s22   ;;  %s1334_s21 = sphi %s1385_s21, %s1605_s21   ;;  %s1330_s20 = sphi %s1383_s20, %s1604_s20   ;;  %s1326_s19 = sphi %s1381_s19, %s1603_s19   ;;  %s1322_s18 = sphi %s1379_s18, %s1602_s18  }
   0x5   : > { %p29_p0 = scmp.ge.s32.totalorder %s28_s25, 3  ;;  %p912_p1 = scmp.ge.s32.totalorder %s1346_s24, 1 }
   0x6   : > { %p253_p2 = scmp.lt.s32.totalorder %s1346_s24, 97  ;;  %s35_s27 = sadd.s32 1, %s1342_s23 }
   0x7   : > { %s1609_s25 = smov (%p29_p0, %s28_s25), 0  ;;  %s1611_s26 = smov (!%p29_p0, %s31_s26), %s1338_s22 }
   0x8   : > { %p254_p3 = pnand %p912_p1, %p253_p2  ;;  %p33_p4 = scmp.ge.s32.totalorder %s1611_s26, 16 }
   0x9   : > { %p327_p6 = scmp.lt.s32.totalorder (!%p254_p3), %s1322_s18, 2  ;;  %s306_s28 = sadd.s32 (!%p254_p3), %s1322_s18, %s1326_s19  ;;  %v927_v16 = vld [vmem:[%s1595_s2] ss:$0 sm:$0xff] (!%p254_p3)  ;;  %v928_v22 = vld [vmem:[%s1595_s2 + $0x1] ss:$0 sm:$0xff] (!%p254_p3)  ;;  %vm378_vm0 = vcmask (!%p254_p3), 1040384  }
   0xa   : > { %s1613_s26 = smov (%p33_p4, %s1611_s26), 0  ;;  %s1615_s27 = smov (!%p33_p4, %s35_s27), %s1342_s23 }
   0xb   : > { %p37_p5 = scmp.ge.s32.totalorder %s1615_s27, 2  ;;  %257 = sbr.rel (%p254_p3) target bundleno = 349 (0x15d), region = 32  ;;  %vm946_vm1 = vmneg (!%p254_p3), %vm378_vm0  ;;  %vm422_vm2 = vcmask (!%p254_p3), 1046528   ;;  %vm597_vm3 = vcmask (!%p254_p3), 1045504  }
   0xc   : > { %s1430_s29 = sadd.s32 (!%p254_p3), 4294967295, %s306_s28  ;;  %p312_p7 = scmp.lt.s32.totalorder (!%p254_p3), %s1330_s20, 1 }
   0xd   : > { %s1617_s27 = smov (%p37_p5, %s1615_s27), 0  ;;  %p308_p8 = scmp.gt.s32.totalorder (!%p254_p3), %s1430_s29, 0 }
   0xe   : > { %p914_p9 = scmp.lt.s32.totalorder (!%p254_p3), %s1430_s29, 15  ;;  %p334_p10 = scmp.lt.s32.totalorder (!%p254_p3), %s1326_s19, 15 }
   0xf   : > { %s1600_s1 = sld [smem:[#allocation2_spill]] (!%p254_p3)  ;;  %p349_p11 = scmp.ge.s32.totalorder (!%p254_p3), %s1430_s29, 0 }
  0x10   : > { %p350_p13 = scmp.lt.s32.totalorder (!%p254_p3), %s1430_s29, 16  ;;  %p682_p1 = scmp.eq.s32.totalorder (!%p254_p3), %s1322_s18, 0 }
  0x11   : > { %p964_p2 = scmp.ne.s32.totalorder (!%p254_p3), %s1322_s18, 0 }
  0x12   : > { %s328_s30 = scalar_select %p327_p6, %s1322_s18, 2 }
  0x13   : > { %s309_s7 = scalar_select %p308_p8, %s1430_s29, 0 }
  0x14   : > { %s1234_s6 = smul.u32 384, %s328_s30  ;;  %s1621_s20 = smov (!%p312_p7, %s1330_s20), 1 }
  0x15   : > { %s1619_s7 = smov (!%p914_p9, %s309_s7), 15  ;;  %s920_s11 = sshll.u32 %s1621_s20, 5 }
  0x16   : > { %s1441_s10 = scalar_lea.vmem %s1600_s1, %s1234_s6  ;;  %p314_p12 = scmp.lt.s32.totalorder %s1619_s7, 15 }
  0x17   : > { %v387_v0 = vld [vmem:[%s1441_s10] sm:$0xff]  ;;  %v388_v1 = vld [vmem:[%s1441_s10 + $0x8] sm:$0xff]  ;;  %v389_v2 = vld [vmem:[%s1441_s10 + $0x10] sm:$0xff]  ;;  %s1461_s14 = scalar_lea.vmem %s1597_s4, %s1621_s20  ;;  %s1474_s30 = scalar_lea.vmem %s1598_s5, %s1621_s20 }
  0x18   : > { %v1166_v3 = vpack.c.bf16 %v388_v1, %v387_v0  ;;  %v390_v4 = vld [vmem:[%s1441_s10 + $0x18] sm:$0xff]  ;;  %v391_v6 = vld [vmem:[%s1441_s10 + $0x20] sm:$0xff]  ;;  %v392_v7 = vld [vmem:[%s1441_s10 + $0x28] sm:$0xff]  ;;  %s1623_s7 = smov (!%p314_p12, %s1619_s7), 15  ;;  %p1500_p0 = pnand %p350_p13, %p349_p11 }
  0x19   : > { %v1170_v5 = vpack.c.bf16 %v390_v4, %v389_v2  ;;  %v1174_v8 = vpack.c.bf16 %v392_v7, %v391_v6  ;;  %v930_v9 = vld [vmem:[%s1441_s10 + $0x80] sm:$0xff]  ;;  %v931_v10 = vld [vmem:[%s1441_s10 + $0x88] sm:$0xff]  ;;  %s335_s15 = scalar_select %p334_p10, %s1326_s19, 15  ;;  %v393_v11 = vld [vmem:[%s1441_s10 + $0x30] sm:$0xff] }
  0x1a   : > { %1167 = vmatprep.subr.bf16.mxu0 %v1166_v3  ;;  %v394_v12 = vld [vmem:[%s1441_s10 + $0x38] sm:$0xff]  ;;  %v1134_v13 = vpack.c.bf16 %v931_v10, %v930_v9  ;;  %s919_s16 = sshll.u32 %s1623_s7, 1  ;;  %v932_v14 = vld [vmem:[%s1441_s10 + $0x90] sm:$0xff]  ;;  %v934_v18 = vld [vmem:[%s1441_s10 + $0xa0] sm:$0xff] }
  0x1b   : > { %1169 = vmatpush3.bf16.msra.mxu0 %v1166_v3  ;;  %s318_s6 = sadd.s32 %s920_s11, %s919_s16  ;;  %s923_s8 = sshll.u32 %s335_s15, 1  ;;  %v933_v15 = vld [vmem:[%s1441_s10 + $0x98] sm:$0xff]  ;;  %v935_v19 = vld [vmem:[%s1441_s10 + $0xa8] sm:$0xff]  ;;  %v1178_v20 = vpack.c.bf16 %v394_v12, %v393_v11  ;;  %v395_v21 = vld [vmem:[%s1441_s10 + $0x40] sm:$0xff] }
  0x1c   : > { %1171 = vmatprep.subr.bf16.mxu0 %v1170_v5  ;;  %1135 = vmatprep.subr.bf16.mxu1 %v1134_v13  ;;  %s921_s9 = sshll.u32 %s318_s6, 3  ;;  %s338_s12 = sadd.s32 %s923_s8, %s920_s11  ;;  %v1138_v17 = vpack.c.bf16 %v933_v15, %v932_v14  ;;  %v396_v23 = vld [vmem:[%s1441_s10 + $0x48] sm:$0xff]  ;;  %v1142_v26 = vpack.c.bf16 %v935_v19, %v934_v18  ;;  %v936_v29 = vld [vmem:[%s1441_s10 + $0xb0] sm:$0xff]  ;;  %v937_v30 = vld [vmem:[%s1441_s10 + $0xb8] sm:$0xff] }
  0x1d   : > { %1137 = vmatpush3.bf16.msra.mxu1 %v1134_v13  ;;  %s320_s15 = scalar_lea.vmem %s1593_s0, %s921_s9  ;;  %s925_s16 = sshll.u32 %s338_s12, 3  ;;  %v1182_v31 = vpack.c.bf16 %v396_v23, %v395_v21  ;;  %v397_v34 = vld [vmem:[%s1441_s10 + $0x50] sm:$0xff]  ;;  %v398_v35 = vld [vmem:[%s1441_s10 + $0x58] sm:$0xff]  ;;  %v1146_v36 = vpack.c.bf16 %v937_v30, %v936_v29  ;;  %v938_v40 = vld [vmem:[%s1441_s10 + $0xc0] sm:$0xff] }
  0x1e   : > { %s1494_s6 = scalar_lea.vmem %s1596_s3, %s925_s16  ;;  %v353_v24 = vld [vmem:[%s320_s15] sm:$0xff]  ;;  %v354_v25 = vld [vmem:[%s320_s15 + $0x8] sm:$0xff]  ;;  %1139 = vmatprep.subr.bf16.mxu1 %v1138_v17  ;;  %v1186_v42 = vpack.c.bf16 %v398_v35, %v397_v34  ;;  %v940_v50 = vld [vmem:[%s1441_s10 + $0xd0] sm:$0xff] }
  0x1f   : > { %1173 = vmatpush3.bf16.msra.mxu0 %v1170_v5  ;;  %v360_v27 = vmul.f32 %v927_v16, %v353_v24  ;;  %v361_v28 = vmul.f32 %v927_v16, %v354_v25  ;;  %s929_s9 = scalar_select %p1500_p0, 0, 1  ;;  %v939_v41 = vld [vmem:[%s1441_s10 + $0xc8] sm:$0xff]  ;;  %v399_v45 = vld [vmem:[%s1441_s10 + $0x60] sm:$0xff]  ;;  %v941_v51 = vld [vmem:[%s1441_s10 + $0xd8] sm:$0xff] }
  0x20   : > { %1175 = vmatprep.subr.bf16.mxu0 %v1174_v8  ;;  %v400_v46 = vld [vmem:[%s1441_s10 + $0x68] sm:$0xff]  ;;  %v1150_v49 = vpack.c.bf16 %v939_v41, %v938_v40  ;;  %v401_v55 = vld [vmem:[%s1441_s10 + $0x70] sm:$0xff]  ;;  %v402_v56 = vld [vmem:[%s1441_s10 + $0x78] sm:$0xff]  ;;  %v1154_v59 = vpack.c.bf16 %v941_v51, %v940_v50 }
  0x21   : > { %v367_v32 = vadd.f32 %v928_v22, %v360_v27  ;;  %v368_v33 = vadd.f32 %v928_v22, %v361_v28  ;;  %1141 = vmatpush3.bf16.msra.mxu1 %v1138_v17  ;;  %s372_s29 = scvt.s32.f32 %s929_s9  ;;  %v1190_v52 = vpack.c.bf16 %v400_v46, %v399_v45  ;;  %v942_v60 = vld [vmem:[%s1441_s10 + $0xe0] sm:$0xff]  ;;  %v943_v61 = vld [vmem:[%s1441_s10 + $0xe8] sm:$0xff]  ;;  %v1194_v63 = vpack.c.bf16 %v402_v56, %v401_v55  ;;  %v944_v3 = vld [vmem:[%s1441_s10 + $0xf0] sm:$0xff] }
  0x22   : > { %1143 = vmatprep.subr.bf16.mxu1 %v1142_v26  ;;  %v948_v0 = vld [vmem:[%s1441_s10 + $0x100] sm:$0xff]  ;;  %v949_v1 = vld [vmem:[%s1441_s10 + $0x108] sm:$0xff]  ;;  %v1158_v2 = vpack.c.bf16 %v943_v61, %v942_v60  ;;  %v945_v4 = vld [vmem:[%s1441_s10 + $0xf8] sm:$0xff] }
  0x23   : > { %1177 = vmatpush3.bf16.msra.mxu0 %v1174_v8  ;;  %v369_v37 = vmax.f32 %v367_v32, 0.0  ;;  %v370_v38 = vmax.f32 %v368_v33, 0.0  ;;  %v373_v39 = vstv %s372_s29  ;;  %v1198_v5 = vpack.c.bf16 %v949_v1, %v948_v0  ;;  %v950_v8 = vld [vmem:[%s1441_s10 + $0x110] sm:$0xff]  ;;  %v951_v9 = vld [vmem:[%s1441_s10 + $0x118] sm:$0xff]  ;;  %v952_v14 = vld [vmem:[%s1441_s10 + $0x120] sm:$0xff] }
  0x24   : > { %1179 = vmatprep.subr.bf16.mxu0 %v1178_v20  ;;  %v1162_v10 = vpack.c.bf16 %v945_v4, %v944_v3  ;;  %v1202_v12 = vpack.c.bf16 %v951_v9, %v950_v8  ;;  %v953_v15 = vld [vmem:[%s1441_s10 + $0x128] sm:$0xff]  ;;  %v954_v18 = vld [vmem:[%s1441_s10 + $0x130] sm:$0xff]  ;;  %v955_v19 = vld [vmem:[%s1441_s10 + $0x138] sm:$0xff] }
  0x25   : > { %v374_v43 = vmul.f32 %v373_v39, %v369_v37  ;;  %v375_v44 = vmul.f32 %v373_v39, %v370_v38  ;;  %1145 = vmatpush3.bf16.msra.mxu1 %v1142_v26  ;;  %v1206_v17 = vpack.c.bf16 %v953_v15, %v952_v14  ;;  %v1210_v21 = vpack.c.bf16 %v955_v19, %v954_v18  ;;  %v956_v22 = vld [vmem:[%s1441_s10 + $0x140] sm:$0xff]  ;;  %v957_v23 = vld [vmem:[%s1441_s10 + $0x148] sm:$0xff]  ;;  %v958_v25 = vld [vmem:[%s1441_s10 + $0x150] sm:$0xff] }
  0x26   : > { %1147 = vmatprep.subr.bf16.mxu1 %v1146_v36  ;;  %v1214_v24 = vpack.c.bf16 %v957_v23, %v956_v22  ;;  %v959_v26 = vld [vmem:[%s1441_s10 + $0x158] sm:$0xff]  ;;  %v960_v28 = vld [vmem:[%s1441_s10 + $0x160] sm:$0xff]  ;;  %v961_v29 = vld [vmem:[%s1441_s10 + $0x168] sm:$0xff] }
  0x27   : > { %1181 = vmatpush3.bf16.msra.mxu0 %v1178_v20  ;;  %v379_v47 = vrot.slane %v374_v43, 7  ;;  %v380_v48 = vrot.slane %v375_v44, 7  ;;  %v1218_v27 = vpack.c.bf16 %v959_v26, %v958_v25  ;;  %v1222_v30 = vpack.c.bf16 %v961_v29, %v960_v28  ;;  %v963_v32 = vld [vmem:[%s1441_s10 + $0x178] sm:$0xff] }
  0x28   : > { %1183 = vmatprep.subr.bf16.mxu0 %v1182_v31 }
  0x29   : > { %1096 = vmatprep.mubr.msk.f32.mxu0 %vm946_vm1, %v379_v47  ;;  %v1518_v53 = vsel %vm378_vm0, %v379_v47, %v380_v48  ;;  %v385_v54 = vsel %vm378_vm0, 0.0, %v379_v47  ;;  %1149 = vmatpush3.bf16.msra.mxu1 %v1146_v36  ;;  %v386_v11 = vsel %vm378_vm0, %v380_v48, 0.0 }
  0x2a   : > { %v424_v57 = vrot.slane %v1518_v53, 1  ;;  %v423_v58 = vrot.slane %v385_v54, 1  ;;  %1151 = vmatprep.subr.bf16.mxu1 %v1150_v49  ;;  %v599_v6 = vrot.slane %v1518_v53, 2  ;;  %v598_v7 = vrot.slane %v385_v54, 2 }
  0x2b   : > { %1185 = vmatpush3.bf16.msra.mxu0 %v1182_v31  ;;  %v426_v16 = vrot.slane %v386_v11, 1  ;;  %v962_v31 = vld [vmem:[%s1441_s10 + $0x170] sm:$0xff]  ;;  %v601_v34 = vrot.slane %v386_v11, 2 }
  0x2c   : > { %1187 = vmatprep.subr.bf16.mxu0 %v1186_v42  ;;  %v425_v62 = vsel %vm422_vm2, %v423_v58, %v424_v57  ;;  %v600_v13 = vsel %vm597_vm3, %v598_v7, %v599_v6  ;;  %v1226_v33 = vpack.c.bf16 %v963_v32, %v962_v31 }
  0x2d   : > { %1061 = vmatprep.mubr.f32.mxu1 %v425_v62  ;;  %1153 = vmatpush3.bf16.msra.mxu1 %v1150_v49  ;;  %v427_v20 = vsel %vm422_vm2, %v424_v57, %v426_v16  ;;  %v602_v35 = vsel %vm597_vm3, %v599_v6, %v601_v34 }
  0x2e   : > { %1155 = vmatprep.subr.bf16.mxu1 %v1154_v59 }
  0x2f   : > { %1189 = vmatpush3.bf16.msra.mxu0 %v1186_v42 }
  0x30   : > { %1191 = vmatprep.subr.bf16.mxu0 %v1190_v52 }
  0x31   : > { %1157 = vmatpush3.bf16.msra.mxu1 %v1154_v59 }
  0x32   : > { %1159 = vmatprep.subr.bf16.mxu1 %v1158_v2 }
  0x33   : > { %1193 = vmatpush3.bf16.msra.mxu0 %v1190_v52 }
  0x34   : > { %1195 = vmatprep.subr.bf16.mxu0 %v1194_v63 }
  0x35   : > { %1161 = vmatpush3.bf16.msra.mxu1 %v1158_v2 }
  0x36   : > { %1163 = vmatprep.subr.bf16.mxu1 %v1162_v10 }
  0x37   : > { %1197 = vmatpush3.bf16.msra.mxu0 %v1194_v63 }
  0x38   : > { %1199 = vmatprep.subr.bf16.mxu0 %v1198_v5 }
  0x39   : > { %1165 = vmatpush3.bf16.msra.mxu1 %v1162_v10 }
  0x3a   : > { %1097 = vmatmul.mubr.f32.vlgmr.msra.gmra.mrb[0].mxu0 %v1518_v53 }
  0x3b   : > { %1201 = vmatpush3.bf16.msra.mxu0 %v1198_v5  ;;  %1131 = vmatprep.mubr.f32.mxu0 %v600_v13 }
  0x3c   : > { %1203 = vmatprep.subr.bf16.mxu0 %v1202_v12  ;;  %1062 = vmatmul.mubr.f32.vlgmr.msra.gmra.mrb[0].mxu1 %v427_v20 }
  0x3f   : > { %1205 = vmatpush3.bf16.msra.mxu0 %v1202_v12 }
  0x40   : > { %1207 = vmatprep.subr.bf16.mxu0 %v1206_v17 }
  0x43   : > { %1209 = vmatpush3.bf16.msra.mxu0 %v1206_v17 }
  0x44   : > { %1211 = vmatprep.subr.bf16.mxu0 %v1210_v21 }
  0x47   : > { %1213 = vmatpush3.bf16.msra.mxu0 %v1210_v21 }
  0x48   : > { %1215 = vmatprep.subr.bf16.mxu0 %v1214_v24 }
  0x4b   : > { %1217 = vmatpush3.bf16.msra.mxu0 %v1214_v24 }
  0x4c   : > { %1219 = vmatprep.subr.bf16.mxu0 %v1218_v27 }
  0x4f   : > { %1221 = vmatpush3.bf16.msra.mxu0 %v1218_v27 }
  0x50   : > { %1223 = vmatprep.subr.bf16.mxu0 %v1222_v30 }
  0x53   : > { %1225 = vmatpush3.bf16.msra.mxu0 %v1222_v30 }
  0x54   : > { %1227 = vmatprep.subr.bf16.mxu0 %v1226_v33 }
  0x57   : > { %1229 = vmatpush3.bf16.msra.mxu0 %v1226_v33 }
  0x5a   : > { %1132 = vmatmul.mubr.f32.vlgmr.msra.gmra.mrb[0].mxu0 %v602_v35 }
 0x10f   : > { %v1063_v36 = vpop.f32.mrb[0].mxu1 }
 0x110   : > { %v496_v37 = vpop.f32.mrb[1].mxu1 }
 0x129   : > { %685 = sbr.rel (%p964_p2) target bundleno = 306 (0x132), region = 36 }
 0x12d   : > { %v1133_v38 = vpop.f32.mrb[0].mxu0 }
 0x12e   : > { %v1230_v39 = vadd.f32 %v1133_v38, %v1063_v36  ;;  %v671_v40 = vpop.f32.mrb[1].mxu0 }
 0x12f   : > { %v1231_v41 = vadd.f32 %v671_v40, %v496_v37 }
 0x130   : > { %687 = vst [vmem:[%s1494_s6 + $0x8] sm:$0xff] %v1230_v39 }
 0x131   : > { %686 = vst [vmem:[%s1494_s6] sm:$0xff] %v1231_v41 }
 0x132 PF: > { %p965_p3 = scmp.le.s32.totalorder %s1322_s18, 0 }
 0x134   : > { %691 = sbr.rel (%p965_p3) target bundleno = 317 (0x13d), region = 40 }
 0x138   : > { %v692_v42 = vld [vmem:[%s1494_s6] sm:$0xff] (!%p965_p3) }
 0x139   : > { %v693_v43 = vld [vmem:[%s1494_s6 + $0x8] sm:$0xff] (!%p965_p3)  ;;  %v694_v44 = vadd.f32 (!%p965_p3), %v1231_v41, %v692_v42 }
 0x13a   : > { %v695_v45 = vadd.f32 (!%p965_p3), %v1230_v39, %v693_v43 }
 0x13b   : > { %696 = vst [vmem:[%s1494_s6] sm:$0xff] %v694_v44 }
 0x13c   : > { %697 = vst [vmem:[%s1494_s6 + $0x8] sm:$0xff] %v695_v45 }
 0x13d PF: > { %p698_p4 = scmp.eq.s32.totalorder %s1326_s19, 0 }
 0x13f   : > { %p699_p5 = pnand %p698_p4, %p682_p1 }
 0x140   : > { %v1348_v46 = vmov (!%p699_p5), 0.0  }
 0x141   : > { %702 = sbr.rel (%p699_p5) target bundleno = 328 (0x148), region = 44  ;;  %703 = vst [vmem:[%s1461_s14] sm:$0x1] (!%p699_p5), %v1348_v46  ;;  %704 = vst [vmem:[%s1474_s30] sm:$0x1] (!%p699_p5), %v1348_v46 }
 0x148 PF: > { %p966_p6 = scmp.ne.s32.totalorder %s1322_s18, 2 }
 0x149   : > { %v709_v47 = vld [vmem:[%s1494_s6] sm:$0xff] (!%p966_p6)  ;;  %v710_v48 = vld [vmem:[%s1494_s6 + $0x8] sm:$0xff] (!%p966_p6) }
 0x14a   : > { %708 = sbr.rel (%p966_p6) target bundleno = 349 (0x15d), region = 48  ;;  %v712_v49 = vadd.f32 (!%p966_p6), %v710_v48, %v709_v47  ;;  %v722_v50 = vmul.f32 (!%p966_p6), %v709_v47, %v709_v47  ;;  %v723_v51 = vmul.f32 (!%p966_p6), %v710_v48, %v710_v48  ;;  %v711_v62 = vld [vmem:[%s1461_s14] sm:$0x1] (!%p966_p6) }
 0x14b   : > { %v721_v1 = vld [vmem:[%s1474_s30] sm:$0x1] (!%p966_p6) }
 0x14c   : > { %v713_v52 = vrot.slane (!%p966_p6), %v712_v49, 4  ;;  %v724_v53 = vadd.f32 (!%p966_p6), %v723_v51, %v722_v50 }
 0x14e   : > { %v714_v54 = vadd.f32 (!%p966_p6), %v713_v52, %v712_v49  ;;  %v725_v55 = vrot.slane (!%p966_p6), %v724_v53, 4 }
 0x150   : > { %v715_v56 = vrot.slane (!%p966_p6), %v714_v54, 2  ;;  %v726_v57 = vadd.f32 (!%p966_p6), %v725_v55, %v724_v53 }
 0x152   : > { %v716_v58 = vadd.f32 %v715_v56, %v714_v54  ;;  %v727_v59 = vrot.slane %v726_v57, 2 }
 0x154   : > { %v717_v60 = vrot.slane %v716_v58, 1  ;;  %v728_v61 = vadd.f32 %v727_v59, %v726_v57 }
 0x156   : > { %v718_v63 = vadd.f32 %v717_v60, %v716_v58  ;;  %v729_v0 = vrot.slane %v728_v61, 1 }
 0x158   : > { %v719_v2 = vadd.f32 %v718_v63, %v711_v62  ;;  %v730_v3 = vadd.f32 %v729_v0, %v728_v61 }
 0x15a   : > { %720 = vst [vmem:[%s1461_s14] sm:$0x1] %v719_v2  ;;  %v731_v4 = vadd.f32 %v730_v3, %v721_v1 }
 0x15c   : > { %732 = vst [vmem:[%s1474_s30] sm:$0x1] %v731_v4 }
 0x15d PF: > { %s16_s24 = sadd.s32 1, %s1346_s24   ;;  %s1602_s18 = smov %s1334_s21 }
 0x15e   : > { %p13_p7 = scmp.ge.s32.totalorder %s16_s24, 98   ;;  %s1603_s19 = smov %s1338_s22 }
 0x15f   : > { %s1604_s20 = smov %s1342_s23  ;;  %s1605_s21 = smov %s1609_s25 }
 0x160   : > { %s1606_s22 = smov %s1613_s26  ;;  %s1607_s23 = smov %s1617_s27 }
 0x161   :  { %15 = sbr.rel (!%p13_p7) target bundleno = 4 (0x4), region = 107 }

// kernel: residual_block_forward.4
= control target key start
LH: loop header
LB: loop body
LE: loop exit
PB: predicated region body
PF: predicated region fallthrough
CT: control target
= control target key end

     0   :  { %s1361_s18 = smov 0   ;;  %s1363_s19 = smov 0   ;;  %s1569_s0 = inlined_call_operand.vmem [shape: f32[2,16,16,128], index: 0, kind: input, shape index: {}]   ;;  %s1570_s1 = inlined_call_operand.vmem [shape: f32[3,3,128,128], index: 1, kind: input, shape index: {}]   ;;  %s1571_s2 = inlined_call_operand.vmem [shape: f32[2,128], index: 2, kind: input, shape index: {}]   ;;  %s1572_s3 = inlined_call_operand.vmem [shape: f32[2,16,16,128], index: 3, kind: output, shape index: {0}]   ;;  %s1573_s4 = inlined_call_operand.vmem [shape: f32[2,1,128], index: 4, kind: output, shape index: {1}]   ;;  %s1574_s5 = inlined_call_operand.vmem [shape: f32[2,1,128], index: 5, kind: output, shape index: {2}]  }
   0x1   :  { %s1365_s20 = smov 0   ;;  %s1367_s21 = smov 0  }
   0x2   :  { %s1369_s22 = smov 0   ;;  %s1371_s2 = smov 0  }
   0x3   :  { %s1373_s23 = smov 0  }
   0x4 LB: > { %s28_s24 = sadd.s32 1, %s1316_s21  ;;  %s31_s25 = sadd.s32 1, %s1320_s22  ;;  %s1328_s23 = sphi %s1373_s23, %s16_s23   ;;  %s1324_s2 = sphi %s1371_s2, %s1581_s2   ;;  %s1320_s22 = sphi %s1369_s22, %s1580_s22   ;;  %s1316_s21 = sphi %s1367_s21, %s1579_s21   ;;  %s1312_s20 = sphi %s1365_s20, %s1578_s20   ;;  %s1308_s19 = sphi %s1363_s19, %s1577_s19   ;;  %s1304_s18 = sphi %s1361_s18, %s1576_s18  }
   0x5   : > { %p29_p0 = scmp.ge.s32.totalorder %s28_s24, 3  ;;  %p896_p1 = scmp.ge.s32.totalorder %s1328_s23, 1 }
   0x6   : > { %p253_p2 = scmp.lt.s32.totalorder %s1328_s23, 97  ;;  %s35_s26 = sadd.s32 1, %s1324_s2 }
   0x7   : > { %s1583_s24 = smov (%p29_p0, %s28_s24), 0  ;;  %s1585_s25 = smov (!%p29_p0, %s31_s25), %s1320_s22 }
   0x8   : > { %p254_p3 = pnand %p896_p1, %p253_p2  ;;  %p33_p4 = scmp.ge.s32.totalorder %s1585_s25, 16 }
   0x9   : > { %p327_p6 = scmp.lt.s32.totalorder (!%p254_p3), %s1304_s18, 2  ;;  %s306_s27 = sadd.s32 (!%p254_p3), %s1304_s18, %s1308_s19  ;;  %vm362_vm0 = vcmask (!%p254_p3), 1040384   ;;  %vm406_vm2 = vcmask (!%p254_p3), 1046528   ;;  %vm581_vm3 = vcmask (!%p254_p3), 1045504  }
   0xa   : > { %s1587_s25 = smov (%p33_p4, %s1585_s25), 0  ;;  %s1589_s26 = smov (!%p33_p4, %s35_s26), %s1324_s2 }
   0xb   : > { %p37_p5 = scmp.ge.s32.totalorder %s1589_s26, 2  ;;  %257 = sbr.rel (%p254_p3) target bundleno = 349 (0x15d), region = 32  ;;  %vm928_vm1 = vmneg (!%p254_p3), %vm362_vm0 }
   0xc   : > { %s1412_s28 = sadd.s32 (!%p254_p3), 4294967295, %s306_s27  ;;  %p312_p7 = scmp.lt.s32.totalorder (!%p254_p3), %s1312_s20, 1 }
   0xd   : > { %s1591_s26 = smov (%p37_p5, %s1589_s26), 0  ;;  %p308_p8 = scmp.gt.s32.totalorder (!%p254_p3), %s1412_s28, 0 }
   0xe   : > { %p898_p9 = scmp.lt.s32.totalorder (!%p254_p3), %s1412_s28, 15  ;;  %p334_p10 = scmp.lt.s32.totalorder (!%p254_p3), %s1308_s19, 15 }
   0xf   : > { %p349_p11 = scmp.ge.s32.totalorder (!%p254_p3), %s1412_s28, 0  ;;  %p350_p13 = scmp.lt.s32.totalorder (!%p254_p3), %s1412_s28, 16 }
  0x10   : > { %p666_p1 = scmp.eq.s32.totalorder (!%p254_p3), %s1304_s18, 0  ;;  %p946_p2 = scmp.ne.s32.totalorder (!%p254_p3), %s1304_s18, 0 }
  0x11   : > { %p1473_p0 = pnand (!%p254_p3), %p350_p13, %p349_p11 }
  0x12   : > { %s328_s29 = scalar_select %p327_p6, %s1304_s18, 2 }
  0x13   : > { %s309_s6 = scalar_select %p308_p8, %s1412_s28, 0 }
  0x14   : > { %s1216_s30 = smul.u32 384, %s328_s29  ;;  %s1595_s20 = smov (!%p312_p7, %s1312_s20), 1 }
  0x15   : > { %s1593_s6 = smov (!%p898_p9, %s309_s6), 15  ;;  %s904_s10 = sshll.u32 %s1595_s20, 5 }
  0x16   : > { %s1423_s9 = scalar_lea.vmem %s1570_s1, %s1216_s30  ;;  %p314_p12 = scmp.lt.s32.totalorder %s1593_s6, 15 }
  0x17   : > { %v371_v0 = vld [vmem:[%s1423_s9] sm:$0xff]  ;;  %v372_v1 = vld [vmem:[%s1423_s9 + $0x8] sm:$0xff]  ;;  %v373_v2 = vld [vmem:[%s1423_s9 + $0x10] sm:$0xff]  ;;  %s1443_s13 = scalar_lea.vmem %s1573_s4, %s1595_s20  ;;  %s1456_s27 = scalar_lea.vmem %s1574_s5, %s1595_s20 }
  0x18   : > { %v1148_v3 = vpack.c.bf16 %v372_v1, %v371_v0  ;;  %v374_v4 = vld [vmem:[%s1423_s9 + $0x18] sm:$0xff]  ;;  %v375_v6 = vld [vmem:[%s1423_s9 + $0x20] sm:$0xff]  ;;  %v376_v7 = vld [vmem:[%s1423_s9 + $0x28] sm:$0xff]  ;;  %s1597_s6 = smov (!%p314_p12, %s1593_s6), 15 }
  0x19   : > { %v1152_v5 = vpack.c.bf16 %v374_v4, %v373_v2  ;;  %v1156_v8 = vpack.c.bf16 %v376_v7, %v375_v6  ;;  %v912_v9 = vld [vmem:[%s1423_s9 + $0x80] sm:$0xff]  ;;  %v913_v10 = vld [vmem:[%s1423_s9 + $0x88] sm:$0xff]  ;;  %s335_s14 = scalar_select %p334_p10, %s1308_s19, 15  ;;  %v377_v11 = vld [vmem:[%s1423_s9 + $0x30] sm:$0xff] }
  0x1a   : > { %1149 = vmatprep.subr.bf16.mxu0 %v1148_v3  ;;  %v378_v12 = vld [vmem:[%s1423_s9 + $0x38] sm:$0xff]  ;;  %v1116_v13 = vpack.c.bf16 %v913_v10, %v912_v9  ;;  %s903_s15 = sshll.u32 %s1597_s6, 1  ;;  %v914_v14 = vld [vmem:[%s1423_s9 + $0x90] sm:$0xff]  ;;  %v916_v17 = vld [vmem:[%s1423_s9 + $0xa0] sm:$0xff] }
  0x1b   : > { %1151 = vmatpush3.bf16.msra.mxu0 %v1148_v3  ;;  %s318_s29 = sadd.s32 %s904_s10, %s903_s15  ;;  %s907_s30 = sshll.u32 %s335_s14, 1  ;;  %v915_v15 = vld [vmem:[%s1423_s9 + $0x98] sm:$0xff]  ;;  %v917_v18 = vld [vmem:[%s1423_s9 + $0xa8] sm:$0xff]  ;;  %v1160_v19 = vpack.c.bf16 %v378_v12, %v377_v11  ;;  %v379_v20 = vld [vmem:[%s1423_s9 + $0x40] sm:$0xff] }
  0x1c   : > { %1153 = vmatprep.subr.bf16.mxu0 %v1152_v5  ;;  %1117 = vmatprep.subr.bf16.mxu1 %v1116_v13  ;;  %s905_s7 = sshll.u32 %s318_s29, 3  ;;  %s338_s8 = sadd.s32 %s907_s30, %s904_s10  ;;  %v1120_v16 = vpack.c.bf16 %v915_v15, %v914_v14  ;;  %v380_v21 = vld [vmem:[%s1423_s9 + $0x48] sm:$0xff]  ;;  %v1124_v22 = vpack.c.bf16 %v917_v18, %v916_v17  ;;  %v918_v23 = vld [vmem:[%s1423_s9 + $0xb0] sm:$0xff]  ;;  %v919_v24 = vld [vmem:[%s1423_s9 + $0xb8] sm:$0xff] }
  0x1d   : > { %1119 = vmatpush3.bf16.msra.mxu1 %v1116_v13  ;;  %s909_s20 = sshll.u32 %s338_s8, 3  ;;  %s320_s16 = scalar_lea.vmem %s1569_s0, %s905_s7  ;;  %v1164_v25 = vpack.c.bf16 %v380_v21, %v379_v20  ;;  %v381_v26 = vld [vmem:[%s1423_s9 + $0x50] sm:$0xff]  ;;  %v382_v27 = vld [vmem:[%s1423_s9 + $0x58] sm:$0xff]  ;;  %v1128_v30 = vpack.c.bf16 %v919_v24, %v918_v23  ;;  %v920_v32 = vld [vmem:[%s1423_s9 + $0xc0] sm:$0xff] }
  0x1e   : > { %s1467_s12 = scalar_lea.vmem %s1572_s3, %s909_s20  ;;  %1121 = vmatprep.subr.bf16.mxu1 %v1120_v16  ;;  %v353_v28 = vld [vmem:[%s320_s16] sm:$0xff]  ;;  %v354_v29 = vld [vmem:[%s320_s16 + $0x8] sm:$0xff]  ;;  %v1168_v34 = vpack.c.bf16 %v382_v27, %v381_v26  ;;  %v922_v42 = vld [vmem:[%s1423_s9 + $0xd0] sm:$0xff] }
  0x1f   : > { %1155 = vmatpush3.bf16.msra.mxu0 %v1152_v5  ;;  %s911_s17 = scalar_select %p1473_p0, 0, 1  ;;  %v921_v33 = vld [vmem:[%s1423_s9 + $0xc8] sm:$0xff]  ;;  %v383_v37 = vld [vmem:[%s1423_s9 + $0x60] sm:$0xff]  ;;  %v923_v43 = vld [vmem:[%s1423_s9 + $0xd8] sm:$0xff] }
  0x20   : > { %1157 = vmatprep.subr.bf16.mxu0 %v1156_v8  ;;  %v384_v38 = vld [vmem:[%s1423_s9 + $0x68] sm:$0xff]  ;;  %v1132_v41 = vpack.c.bf16 %v921_v33, %v920_v32  ;;  %v385_v47 = vld [vmem:[%s1423_s9 + $0x70] sm:$0xff]  ;;  %v386_v48 = vld [vmem:[%s1423_s9 + $0x78] sm:$0xff]  ;;  %v1136_v51 = vpack.c.bf16 %v923_v43, %v922_v42 }
  0x21   : > { %1123 = vmatpush3.bf16.msra.mxu1 %v1120_v16  ;;  %s356_s28 = scvt.s32.f32 %s911_s17  ;;  %v1172_v44 = vpack.c.bf16 %v384_v38, %v383_v37  ;;  %v924_v52 = vld [vmem:[%s1423_s9 + $0xe0] sm:$0xff]  ;;  %v925_v53 = vld [vmem:[%s1423_s9 + $0xe8] sm:$0xff]  ;;  %v1176_v55 = vpack.c.bf16 %v386_v48, %v385_v47  ;;  %v926_v59 = vld [vmem:[%s1423_s9 + $0xf0] sm:$0xff] }
  0x22   : > { %1125 = vmatprep.subr.bf16.mxu1 %v1124_v22  ;;  %v930_v56 = vld [vmem:[%s1423_s9 + $0x100] sm:$0xff]  ;;  %v931_v57 = vld [vmem:[%s1423_s9 + $0x108] sm:$0xff]  ;;  %v1140_v58 = vpack.c.bf16 %v925_v53, %v924_v52  ;;  %v927_v60 = vld [vmem:[%s1423_s9 + $0xf8] sm:$0xff] }
  0x23   : > { %1159 = vmatpush3.bf16.msra.mxu0 %v1156_v8  ;;  %v357_v31 = vstv %s356_s28  ;;  %v1180_v61 = vpack.c.bf16 %v931_v57, %v930_v56  ;;  %v932_v0 = vld [vmem:[%s1423_s9 + $0x110] sm:$0xff]  ;;  %v933_v1 = vld [vmem:[%s1423_s9 + $0x118] sm:$0xff]  ;;  %v1144_v2 = vpack.c.bf16 %v927_v60, %v926_v59  ;;  %v934_v6 = vld [vmem:[%s1423_s9 + $0x120] sm:$0xff] }
  0x24   : > { %1161 = vmatprep.subr.bf16.mxu0 %v1160_v19  ;;  %v358_v35 = vmul.f32 %v357_v31, %v353_v28  ;;  %v359_v36 = vmul.f32 %v357_v31, %v354_v29  ;;  %v1184_v4 = vpack.c.bf16 %v933_v1, %v932_v0  ;;  %v935_v7 = vld [vmem:[%s1423_s9 + $0x128] sm:$0xff]  ;;  %v936_v10 = vld [vmem:[%s1423_s9 + $0x130] sm:$0xff]  ;;  %v937_v11 = vld [vmem:[%s1423_s9 + $0x138] sm:$0xff] }
  0x25   : > { %1127 = vmatpush3.bf16.msra.mxu1 %v1124_v22  ;;  %v1188_v9 = vpack.c.bf16 %v935_v7, %v934_v6  ;;  %v1192_v13 = vpack.c.bf16 %v937_v11, %v936_v10  ;;  %v938_v14 = vld [vmem:[%s1423_s9 + $0x140] sm:$0xff]  ;;  %v939_v15 = vld [vmem:[%s1423_s9 + $0x148] sm:$0xff]  ;;  %v940_v17 = vld [vmem:[%s1423_s9 + $0x150] sm:$0xff] }
  0x26   : > { %1129 = vmatprep.subr.bf16.mxu1 %v1128_v30  ;;  %v363_v39 = vrot.slane %v358_v35, 7  ;;  %v364_v40 = vrot.slane %v359_v36, 7  ;;  %v1196_v16 = vpack.c.bf16 %v939_v15, %v938_v14  ;;  %v941_v18 = vld [vmem:[%s1423_s9 + $0x158] sm:$0xff]  ;;  %v942_v20 = vld [vmem:[%s1423_s9 + $0x160] sm:$0xff]  ;;  %v943_v21 = vld [vmem:[%s1423_s9 + $0x168] sm:$0xff] }
  0x27   : > { %1163 = vmatpush3.bf16.msra.mxu0 %v1160_v19  ;;  %v1200_v19 = vpack.c.bf16 %v941_v18, %v940_v17  ;;  %v1204_v22 = vpack.c.bf16 %v943_v21, %v942_v20  ;;  %v944_v23 = vld [vmem:[%s1423_s9 + $0x170] sm:$0xff]  ;;  %v945_v24 = vld [vmem:[%s1423_s9 + $0x178] sm:$0xff] }
  0x28   : > { %1165 = vmatprep.subr.bf16.mxu0 %v1164_v25  ;;  %1078 = vmatprep.mubr.msk.f32.mxu0 %vm928_vm1, %v363_v39  ;;  %v1494_v45 = vsel %vm362_vm0, %v363_v39, %v364_v40  ;;  %v369_v46 = vsel %vm362_vm0, 0.0, %v363_v39  ;;  %v370_v3 = vsel %vm362_vm0, %v364_v40, 0.0 }
  0x29   : > { %v408_v49 = vrot.slane %v1494_v45, 1  ;;  %1131 = vmatpush3.bf16.msra.mxu1 %v1128_v30  ;;  %v407_v50 = vrot.slane %v369_v46, 1  ;;  %v583_v62 = vrot.slane %v1494_v45, 2  ;;  %v582_v63 = vrot.slane %v369_v46, 2 }
  0x2a   : > { %1133 = vmatprep.subr.bf16.mxu1 %v1132_v41  ;;  %v410_v8 = vrot.slane %v370_v3, 1  ;;  %v585_v26 = vrot.slane %v370_v3, 2 }
  0x2b   : > { %1167 = vmatpush3.bf16.msra.mxu0 %v1164_v25  ;;  %v409_v54 = vsel %vm406_vm2, %v407_v50, %v408_v49  ;;  %v584_v5 = vsel %vm581_vm3, %v582_v63, %v583_v62  ;;  %v1208_v25 = vpack.c.bf16 %v945_v24, %v944_v23 }
  0x2c   : > { %1169 = vmatprep.subr.bf16.mxu0 %v1168_v34  ;;  %1043 = vmatprep.mubr.f32.mxu1 %v409_v54  ;;  %v411_v12 = vsel %vm406_vm2, %v408_v49, %v410_v8  ;;  %v586_v27 = vsel %vm581_vm3, %v583_v62, %v585_v26 }
  0x2d   : > { %1135 = vmatpush3.bf16.msra.mxu1 %v1132_v41 }
  0x2e   : > { %1137 = vmatprep.subr.bf16.mxu1 %v1136_v51 }
  0x2f   : > { %1171 = vmatpush3.bf16.msra.mxu0 %v1168_v34 }
  0x30   : > { %1173 = vmatprep.subr.bf16.mxu0 %v1172_v44 }
  0x31   : > { %1139 = vmatpush3.bf16.msra.mxu1 %v1136_v51 }
  0x32   : > { %1141 = vmatprep.subr.bf16.mxu1 %v1140_v58 }
  0x33   : > { %1175 = vmatpush3.bf16.msra.mxu0 %v1172_v44 }
  0x34   : > { %1177 = vmatprep.subr.bf16.mxu0 %v1176_v55 }
  0x35   : > { %1143 = vmatpush3.bf16.msra.mxu1 %v1140_v58 }
  0x36   : > { %1145 = vmatprep.subr.bf16.mxu1 %v1144_v2 }
  0x37   : > { %1179 = vmatpush3.bf16.msra.mxu0 %v1176_v55 }
  0x38   : > { %1181 = vmatprep.subr.bf16.mxu0 %v1180_v61 }
  0x39   : > { %1147 = vmatpush3.bf16.msra.mxu1 %v1144_v2 }
  0x3a   : > { %1079 = vmatmul.mubr.f32.vlgmr.msra.gmra.mrb[0].mxu0 %v1494_v45 }
  0x3b   : > { %1183 = vmatpush3.bf16.msra.mxu0 %v1180_v61  ;;  %1113 = vmatprep.mubr.f32.mxu0 %v584_v5 }
  0x3c   : > { %1185 = vmatprep.subr.bf16.mxu0 %v1184_v4  ;;  %1044 = vmatmul.mubr.f32.vlgmr.msra.gmra.mrb[0].mxu1 %v411_v12 }
  0x3f   : > { %1187 = vmatpush3.bf16.msra.mxu0 %v1184_v4 }
  0x40   : > { %1189 = vmatprep.subr.bf16.mxu0 %v1188_v9 }
  0x43   : > { %1191 = vmatpush3.bf16.msra.mxu0 %v1188_v9 }
  0x44   : > { %1193 = vmatprep.subr.bf16.mxu0 %v1192_v13 }
  0x47   : > { %1195 = vmatpush3.bf16.msra.mxu0 %v1192_v13 }
  0x48   : > { %1197 = vmatprep.subr.bf16.mxu0 %v1196_v16 }
  0x4b   : > { %1199 = vmatpush3.bf16.msra.mxu0 %v1196_v16 }
  0x4c   : > { %1201 = vmatprep.subr.bf16.mxu0 %v1200_v19 }
  0x4f   : > { %1203 = vmatpush3.bf16.msra.mxu0 %v1200_v19 }
  0x50   : > { %1205 = vmatprep.subr.bf16.mxu0 %v1204_v22 }
  0x53   : > { %1207 = vmatpush3.bf16.msra.mxu0 %v1204_v22 }
  0x54   : > { %1209 = vmatprep.subr.bf16.mxu0 %v1208_v25 }
  0x57   : > { %1211 = vmatpush3.bf16.msra.mxu0 %v1208_v25 }
  0x5a   : > { %1114 = vmatmul.mubr.f32.vlgmr.msra.gmra.mrb[0].mxu0 %v586_v27 }
 0x10f   : > { %v1045_v28 = vpop.f32.mrb[0].mxu1 }
 0x110   : > { %v480_v29 = vpop.f32.mrb[1].mxu1 }
 0x129   : > { %669 = sbr.rel (%p946_p2) target bundleno = 306 (0x132), region = 36 }
 0x12d   : > { %v1115_v30 = vpop.f32.mrb[0].mxu0 }
 0x12e   : > { %v1212_v31 = vadd.f32 %v1115_v30, %v1045_v28  ;;  %v655_v32 = vpop.f32.mrb[1].mxu0 }
 0x12f   : > { %v1213_v33 = vadd.f32 %v655_v32, %v480_v29 }
 0x130   : > { %671 = vst [vmem:[%s1467_s12 + $0x8] sm:$0xff] %v1212_v31 }
 0x131   : > { %670 = vst [vmem:[%s1467_s12] sm:$0xff] %v1213_v33 }
 0x132 PF: > { %p947_p3 = scmp.le.s32.totalorder %s1304_s18, 0 }
 0x134   : > { %675 = sbr.rel (%p947_p3) target bundleno = 317 (0x13d), region = 40 }
 0x138   : > { %v676_v34 = vld [vmem:[%s1467_s12] sm:$0xff] (!%p947_p3) }
 0x139   : > { %v677_v35 = vld [vmem:[%s1467_s12 + $0x8] sm:$0xff] (!%p947_p3)  ;;  %v678_v36 = vadd.f32 (!%p947_p3), %v1213_v33, %v676_v34 }
 0x13a   : > { %v679_v37 = vadd.f32 (!%p947_p3), %v1212_v31, %v677_v35 }
 0x13b   : > { %680 = vst [vmem:[%s1467_s12] sm:$0xff] %v678_v36 }
 0x13c   : > { %681 = vst [vmem:[%s1467_s12 + $0x8] sm:$0xff] %v679_v37 }
 0x13d PF: > { %p682_p4 = scmp.eq.s32.totalorder %s1308_s19, 0 }
 0x13f   : > { %p683_p5 = pnand %p682_p4, %p666_p1 }
 0x140   : > { %v1330_v38 = vmov (!%p683_p5), 0.0  }
 0x141   : > { %686 = sbr.rel (%p683_p5) target bundleno = 328 (0x148), region = 44  ;;  %687 = vst [vmem:[%s1443_s13] sm:$0x1] (!%p683_p5), %v1330_v38  ;;  %688 = vst [vmem:[%s1456_s27] sm:$0x1] (!%p683_p5), %v1330_v38 }
 0x148 PF: > { %p948_p6 = scmp.ne.s32.totalorder %s1304_s18, 2 }
 0x149   : > { %v693_v39 = vld [vmem:[%s1467_s12] sm:$0xff] (!%p948_p6)  ;;  %v694_v40 = vld [vmem:[%s1467_s12 + $0x8] sm:$0xff] (!%p948_p6) }
 0x14a   : > { %692 = sbr.rel (%p948_p6) target bundleno = 349 (0x15d), region = 48  ;;  %v696_v41 = vadd.f32 (!%p948_p6), %v694_v40, %v693_v39  ;;  %v706_v42 = vmul.f32 (!%p948_p6), %v693_v39, %v693_v39  ;;  %v707_v43 = vmul.f32 (!%p948_p6), %v694_v40, %v694_v40  ;;  %v695_v54 = vld [vmem:[%s1443_s13] sm:$0x1] (!%p948_p6) }
 0x14b   : > { %v705_v57 = vld [vmem:[%s1456_s27] sm:$0x1] (!%p948_p6) }
 0x14c   : > { %v697_v44 = vrot.slane (!%p948_p6), %v696_v41, 4  ;;  %v708_v45 = vadd.f32 (!%p948_p6), %v707_v43, %v706_v42 }
 0x14e   : > { %v698_v46 = vadd.f32 (!%p948_p6), %v697_v44, %v696_v41  ;;  %v709_v47 = vrot.slane (!%p948_p6), %v708_v45, 4 }
 0x150   : > { %v699_v48 = vrot.slane (!%p948_p6), %v698_v46, 2  ;;  %v710_v49 = vadd.f32 (!%p948_p6), %v709_v47, %v708_v45 }
 0x152   : > { %v700_v50 = vadd.f32 %v699_v48, %v698_v46  ;;  %v711_v51 = vrot.slane %v710_v49, 2 }
 0x154   : > { %v701_v52 = vrot.slane %v700_v50, 1  ;;  %v712_v53 = vadd.f32 %v711_v51, %v710_v49 }
 0x156   : > { %v702_v55 = vadd.f32 %v701_v52, %v700_v50  ;;  %v713_v56 = vrot.slane %v712_v53, 1 }
 0x158   : > { %v703_v58 = vadd.f32 %v702_v55, %v695_v54  ;;  %v714_v59 = vadd.f32 %v713_v56, %v712_v53 }
 0x15a   : > { %704 = vst [vmem:[%s1443_s13] sm:$0x1] %v703_v58  ;;  %v715_v60 = vadd.f32 %v714_v59, %v705_v57 }
 0x15c   : > { %716 = vst [vmem:[%s1456_s27] sm:$0x1] %v715_v60 }
 0x15d PF: > { %s16_s23 = sadd.s32 1, %s1328_s23   ;;  %s1576_s18 = smov %s1316_s21 }
 0x15e   : > { %p13_p7 = scmp.ge.s32.totalorder %s16_s23, 98   ;;  %s1577_s19 = smov %s1320_s22 }
 0x15f   : > { %s1578_s20 = smov %s1324_s2  ;;  %s1579_s21 = smov %s1583_s24 }
 0x160   : > { %s1580_s22 = smov %s1587_s25  ;;  %s1581_s2 = smov %s1591_s26 }
 0x161   :  { %15 = sbr.rel (!%p13_p7) target bundleno = 4 (0x4), region = 107 }

// kernel: residual_block_forward.6
= control target key start
LH: loop header
LB: loop body
LE: loop exit
PB: predicated region body
PF: predicated region fallthrough
CT: control target
= control target key end

     0   :  { %s892_s18 = smov 0   ;;  %s894_s19 = smov 0   ;;  %s1031_s0 = inlined_call_operand.vmem [shape: f32[2,16,16,128], index: 0, kind: input, shape index: {}]   ;;  %s1032_s1 = inlined_call_operand.vmem [shape: f32[1,1,128,128], index: 1, kind: input, shape index: {}]   ;;  %s1033_s2 = inlined_call_operand.vmem [shape: f32[2,128], index: 2, kind: input, shape index: {}]   ;;  %s1034_s3 = inlined_call_operand.vmem [shape: f32[2,16,16,128], index: 3, kind: output, shape index: {0}]   ;;  %s1035_s4 = inlined_call_operand.vmem [shape: f32[2,1,128], index: 4, kind: output, shape index: {1}]   ;;  %s1036_s5 = inlined_call_operand.vmem [shape: f32[2,1,128], index: 5, kind: output, shape index: {2}]  }
   0x1   :  { %s896_s20 = smov 0   ;;  %s898_s21 = smov 0  }
   0x2   :  { %s900_s22 = smov 0  }
   0x3 LB: > { %s31_s2 = sadd.s32 1, %s851_s20  ;;  %s35_s23 = sadd.s32 1, %s855_s21  ;;  %s859_s22 = sphi %s900_s22, %s16_s22   ;;  %s855_s21 = sphi %s898_s21, %s1040_s21   ;;  %s851_s20 = sphi %s896_s20, %s1039_s20   ;;  %s847_s19 = sphi %s894_s19, %s1038_s19   ;;  %s843_s18 = sphi %s892_s18, %s1037_s18  }
   0x4   : > { %p33_p0 = scmp.ge.s32.totalorder %s31_s2, 16  ;;  %p672_p1 = scmp.ge.s32.totalorder %s859_s22, 1 }
   0x5   : > { %p249_p2 = scmp.lt.s32.totalorder %s859_s22, 33 }
   0x6   : > { %s1042_s2 = smov (%p33_p0, %s31_s2), 0  ;;  %s1044_s23 = smov (!%p33_p0, %s35_s23), %s855_s21 }
   0x7   : > { %p250_p3 = pnand %p672_p1, %p249_p2  ;;  %p37_p4 = scmp.ge.s32.totalorder %s1044_s23, 2 }
   0x8   : > { %v352_v0 = vld [vmem:[%s1032_s1] sm:$0xff] (!%p250_p3)  ;;  %v353_v1 = vld [vmem:[%s1032_s1 + $0x8] sm:$0xff] (!%p250_p3)  ;;  %v354_v2 = vld [vmem:[%s1032_s1 + $0x10] sm:$0xff] (!%p250_p3)  ;;  %p302_p5 = scmp.gt.s32.totalorder (!%p250_p3), %s843_s18, 0  ;;  %p673_p6 = scmp.lt.s32.totalorder (!%p250_p3), %s843_s18, 15 }
   0x9   : > { %s1046_s23 = smov (%p37_p4, %s1044_s23), 0  ;;  %253 = sbr.rel (%p250_p3) target bundleno = 284 (0x11c), region = 32 }
   0xa   : > { %v748_v3 = vpack.c.bf16 (!%p250_p3), %v353_v1, %v352_v0  ;;  %v355_v4 = vld [vmem:[%s1032_s1 + $0x18] sm:$0xff] (!%p250_p3)  ;;  %p306_p7 = scmp.lt.s32.totalorder (!%p250_p3), %s847_s19, 1  ;;  %v356_v6 = vld [vmem:[%s1032_s1 + $0x20] sm:$0xff] (!%p250_p3)  ;;  %v357_v7 = vld [vmem:[%s1032_s1 + $0x28] sm:$0xff] (!%p250_p3)  ;;  %p341_p8 = scmp.ge.s32.totalorder (!%p250_p3), %s843_s18, 0 }
   0xb   : > { %v752_v5 = vpack.c.bf16 (!%p250_p3), %v355_v4, %v354_v2  ;;  %v756_v8 = vpack.c.bf16 (!%p250_p3), %v357_v7, %v356_v6  ;;  %v358_v9 = vld [vmem:[%s1032_s1 + $0x30] sm:$0xff] (!%p250_p3)  ;;  %v359_v10 = vld [vmem:[%s1032_s1 + $0x38] sm:$0xff] (!%p250_p3)  ;;  %p342_p10 = scmp.lt.s32.totalorder (!%p250_p3), %s843_s18, 16  ;;  %v360_v12 = vld [vmem:[%s1032_s1 + $0x40] sm:$0xff] (!%p250_p3)  ;;  %p459_p12 = scmp.eq.s32.totalorder (!%p250_p3), %s843_s18, 0 }
   0xc   : > { %749 = vmatprep.subr.bf16.mxu0 (!%p250_p3), %v748_v3  ;;  %v760_v11 = vpack.c.bf16 (!%p250_p3), %v359_v10, %v358_v9  ;;  %v361_v13 = vld [vmem:[%s1032_s1 + $0x48] sm:$0xff] (!%p250_p3)  ;;  %v362_v15 = vld [vmem:[%s1032_s1 + $0x50] sm:$0xff] (!%p250_p3)  ;;  %v363_v16 = vld [vmem:[%s1032_s1 + $0x58] sm:$0xff] (!%p250_p3) }
   0xd   : > { %751 = vmatpush3.bf16.msra.mxu0 (!%p250_p3), %v748_v3  ;;  %p343_p11 = pnand (!%p250_p3), %p342_p10, %p341_p8  ;;  %v764_v14 = vpack.c.bf16 (!%p250_p3), %v361_v13, %v360_v12  ;;  %v768_v18 = vpack.c.bf16 (!%p250_p3), %v363_v16, %v362_v15  ;;  %v364_v19 = vld [vmem:[%s1032_s1 + $0x60] sm:$0xff] (!%p250_p3)  ;;  %v365_v20 = vld [vmem:[%s1032_s1 + $0x68] sm:$0xff] (!%p250_p3)  ;;  %v366_v24 = vld [vmem:[%s1032_s1 + $0x70] sm:$0xff] (!%p250_p3) }
   0xe   : > { %753 = vmatprep.subr.bf16.mxu0 (!%p250_p3), %v752_v5  ;;  %v772_v23 = vpack.c.bf16 (!%p250_p3), %v365_v20, %v364_v19  ;;  %v367_v25 = vld [vmem:[%s1032_s1 + $0x78] sm:$0xff] (!%p250_p3) }
   0xf   : > { %v776_v26 = vpack.c.bf16 (!%p250_p3), %v367_v25, %v366_v24 }
  0x10   : > { %s303_s11 = scalar_select %p302_p5, %s843_s18, 0 }
  0x11   : > { %s1048_s19 = smov (!%p306_p7, %s847_s19), 1  ;;  %755 = vmatpush3.bf16.msra.mxu0 %v752_v5  ;;  %v861_v31 = vmov (%p459_p12), 0.0  }
  0x12   : > { %s1050_s11 = smov (!%p673_p6, %s303_s11), 15  ;;  %s953_s14 = scalar_lea.vmem %s1035_s4, %s1048_s19  ;;  %757 = vmatprep.subr.bf16.mxu0 %v756_v8 }
  0x13   : > { %p308_p9 = scmp.lt.s32.totalorder %s1050_s11, 15  ;;  %s966_s27 = scalar_lea.vmem %s1036_s5, %s1048_s19  ;;  %464 = vst [vmem:[%s953_s14] sm:$0x1] (%p459_p12), %v861_v31 }
  0x14   : > { %s679_s28 = sshll.u32 %s1048_s19, 5  ;;  %465 = vst [vmem:[%s966_s27] sm:$0x1] (%p459_p12), %v861_v31 }
  0x15   : > { %s1052_s11 = smov (!%p308_p9, %s1050_s11), 15  ;;  %759 = vmatpush3.bf16.msra.mxu0 %v756_v8 }
  0x16   : > { %s678_s8 = sshll.u32 %s1052_s11, 1  ;;  %761 = vmatprep.subr.bf16.mxu0 %v760_v11 }
  0x17   : > { %s312_s9 = sadd.s32 %s679_s28, %s678_s8 }
  0x18   : > { %s680_s10 = sshll.u32 %s312_s9, 3 }
  0x19   : > { %s314_s15 = scalar_lea.vmem %s1031_s0, %s680_s10  ;;  %763 = vmatpush3.bf16.msra.mxu0 %v760_v11 }
  0x1a   : > { %s684_s11 = scalar_select %p343_p11, 0, 1  ;;  %v345_v17 = vld [vmem:[%s314_s15] sm:$0xff]  ;;  %765 = vmatprep.subr.bf16.mxu0 %v764_v14  ;;  %v346_v27 = vld [vmem:[%s314_s15 + $0x8] sm:$0xff] }
  0x1b   : > { %s328_s26 = scalar_select %p673_p6, %s843_s18, 15 }
  0x1c   : > { %s348_s29 = scvt.s32.f32 %s684_s11 }
  0x1d   : > { %s681_s30 = sshll.u32 %s328_s26, 1  ;;  %767 = vmatpush3.bf16.msra.mxu0 %v764_v14 }
  0x1e   : > { %v349_v21 = vstv %s348_s29  ;;  %s331_s10 = sadd.s32 %s681_s30, %s679_s28  ;;  %769 = vmatprep.subr.bf16.mxu0 %v768_v18 }
  0x1f   : > { %v350_v22 = vmul.f32 %v349_v21, %v345_v17  ;;  %v351_v28 = vmul.f32 %v349_v21, %v346_v27  ;;  %s683_s19 = sshll.u32 %s331_s10, 3 }
  0x20   : > { %s333_s25 = scalar_lea.vmem %s1034_s3, %s683_s19 }
  0x21   : > { %745 = vmatprep.mubr.f32.mxu0 %v350_v22  ;;  %771 = vmatpush3.bf16.msra.mxu0 %v768_v18 }
  0x22   : > { %773 = vmatprep.subr.bf16.mxu0 %v772_v23 }
  0x25   : > { %775 = vmatpush3.bf16.msra.mxu0 %v772_v23 }
  0x26   : > { %777 = vmatprep.subr.bf16.mxu0 %v776_v26 }
  0x29   : > { %779 = vmatpush3.bf16.msra.mxu0 %v776_v26 }
  0x2c   : > { %746 = vmatmul.mubr.f32.vlgmr.msra.gmra.mrb[0].mxu0 %v351_v28 }
  0xfb   : > { %463 = sbr.rel (!%p459_p12) target bundleno = 258 (0x102), region = 44 }
  0xff   : > { %v747_v29 = vpop.f32.mrb[0].mxu0 }
 0x100   : > { %448 = vst [vmem:[%s333_s25 + $0x8] sm:$0xff] %v747_v29  ;;  %v434_v30 = vpop.f32.mrb[1].mxu0 }
 0x101   : > { %447 = vst [vmem:[%s333_s25] sm:$0xff] %v434_v30 }
 0x102 PF: > { %v471_v47 = vld [vmem:[%s953_s14] sm:$0x1] }
 0x103   : > { %v481_v50 = vld [vmem:[%s966_s27] sm:$0x1] }
 0x107   : > { %v470_v33 = vld [vmem:[%s333_s25 + $0x8] sm:$0xff] }
 0x108   : > { %v469_v32 = vld [vmem:[%s333_s25] sm:$0xff]  ;;  %v483_v36 = vmul.f32 %v470_v33, %v470_v33 }
 0x109   : > { %v472_v34 = vadd.f32 %v470_v33, %v469_v32  ;;  %v482_v35 = vmul.f32 %v469_v32, %v469_v32 }
 0x10b   : > { %v473_v37 = vrot.slane %v472_v34, 4  ;;  %v484_v38 = vadd.f32 %v483_v36, %v482_v35 }
 0x10d   : > { %v474_v39 = vadd.f32 %v473_v37, %v472_v34  ;;  %v485_v40 = vrot.slane %v484_v38, 4 }
 0x10f   : > { %v475_v41 = vrot.slane %v474_v39, 2  ;;  %v486_v42 = vadd.f32 %v485_v40, %v484_v38 }
 0x111   : > { %v476_v43 = vadd.f32 %v475_v41, %v474_v39  ;;  %v487_v44 = vrot.slane %v486_v42, 2 }
 0x113   : > { %v477_v45 = vrot.slane %v476_v43, 1  ;;  %v488_v46 = vadd.f32 %v487_v44, %v486_v42 }
 0x115   : > { %v478_v48 = vadd.f32 %v477_v45, %v476_v43  ;;  %v489_v49 = vrot.slane %v488_v46, 1 }
 0x117   : > { %v479_v51 = vadd.f32 %v478_v48, %v471_v47  ;;  %v490_v52 = vadd.f32 %v489_v49, %v488_v46 }
 0x119   : > { %480 = vst [vmem:[%s953_s14] sm:$0x1] %v479_v51  ;;  %v491_v53 = vadd.f32 %v490_v52, %v481_v50 }
 0x11b   : > { %492 = vst [vmem:[%s966_s27] sm:$0x1] %v491_v53 }
 0x11c PF: > { %s16_s22 = sadd.s32 1, %s859_s22   ;;  %s1037_s18 = smov %s851_s20 }
 0x11d   : > { %p13_p13 = scmp.ge.s32.totalorder %s16_s22, 34   ;;  %s1038_s19 = smov %s855_s21 }
 0x11e   : > { %s1039_s20 = smov %s1042_s2  ;;  %s1040_s21 = smov %s1046_s23 }
 0x11f   :  { %15 = sbr.rel (!%p13_p13) target bundleno = 3 (0x3), region = 105 }

// kernel: residual_block_forward.7
= control target key start
LH: loop header
LB: loop body
LE: loop exit
PB: predicated region body
PF: predicated region fallthrough
CT: control target
= control target key end

     0   :  { %s1486_s0 = inlined_call_operand.vmem [shape: f32[512,128], index: 0, kind: input, shape index: {}]   ;;  %s1487_s1 = inlined_call_operand.vmem [shape: f32[2,128], index: 1, kind: input, shape index: {}]   ;;  %s1488_s2 = inlined_call_operand.vmem [shape: f32[512,128], index: 2, kind: input, shape index: {}]   ;;  %s1489_s3 = inlined_call_operand.vmem [shape: f32[2,128], index: 3, kind: input, shape index: {}]   ;;  %s1490_s4 = inlined_call_operand.vmem [shape: f32[512,128], index: 4, kind: output, shape index: {}]  }
   0x1   :  { %v17_v0 = vld [vmem:[%s1486_s0] sm:$0xff]  ;;  %v18_v8 = vld [vmem:[%s1486_s0 + $0x8] sm:$0xff]  ;;  %v19_v10 = vld [vmem:[%s1486_s0 + $0x10] sm:$0xff] }
   0x2   :  { %v656_v1 = vld [vmem:[%s1487_s1] ss:$0 sm:$0xff]  ;;  %v661_v2 = vld [vmem:[%s1487_s1 + $0x1] ss:$0 sm:$0xff]  ;;  %v220_v9 = vld [vmem:[%s1488_s2 + $0x8] sm:$0xff] }
   0x3   :  { %v86_v3 = vmul.f32 %v656_v1, %v17_v0  ;;  %v219_v4 = vld [vmem:[%s1488_s2] sm:$0xff]  ;;  %v87_v12 = vmul.f32 %v656_v1, %v18_v8  ;;  %v88_v14 = vmul.f32 %v656_v1, %v19_v10  ;;  %v221_v15 = vld [vmem:[%s1488_s2 + $0x10] sm:$0xff]  ;;  %v20_v16 = vld [vmem:[%s1486_s0 + $0x18] sm:$0xff] }
   0x4   :  { %v670_v5 = vld [vmem:[%s1489_s3] ss:$0 sm:$0xff]  ;;  %v676_v7 = vld [vmem:[%s1489_s3 + $0x1] ss:$0 sm:$0xff]  ;;  %v222_v17 = vld [vmem:[%s1488_s2 + $0x18] sm:$0xff]  ;;  %v89_v19 = vmul.f32 %v656_v1, %v20_v16 }
   0x5   :  { %v288_v6 = vmul.f32 %v670_v5, %v219_v4  ;;  %v155_v11 = vadd.f32 %v661_v2, %v86_v3  ;;  %v289_v13 = vmul.f32 %v670_v5, %v220_v9  ;;  %v290_v18 = vmul.f32 %v670_v5, %v221_v15  ;;  %v21_v21 = vld [vmem:[%s1486_s0 + $0x20] sm:$0xff]  ;;  %v22_v23 = vld [vmem:[%s1486_s0 + $0x28] sm:$0xff]  ;;  %v23_v29 = vld [vmem:[%s1486_s0 + $0x30] sm:$0xff] }
   0x6   :  { %v291_v20 = vmul.f32 %v670_v5, %v222_v17  ;;  %v223_v22 = vld [vmem:[%s1488_s2 + $0x20] sm:$0xff]  ;;  %v156_v25 = vadd.f32 %v661_v2, %v87_v12  ;;  %v157_v26 = vadd.f32 %v661_v2, %v88_v14  ;;  %v90_v27 = vmul.f32 %v656_v1, %v21_v21  ;;  %v224_v28 = vld [vmem:[%s1488_s2 + $0x28] sm:$0xff]  ;;  %v225_v30 = vld [vmem:[%s1488_s2 + $0x30] sm:$0xff] }
   0x7   :  { %v352_v24 = vadd.f32 %v288_v6, %v155_v11  ;;  %v158_v31 = vadd.f32 %v661_v2, %v89_v19  ;;  %v292_v32 = vmul.f32 %v670_v5, %v223_v22  ;;  %v91_v33 = vmul.f32 %v656_v1, %v22_v23  ;;  %v24_v39 = vld [vmem:[%s1486_s0 + $0x38] sm:$0xff]  ;;  %v25_v53 = vld [vmem:[%s1486_s0 + $0x40] sm:$0xff]  ;;  %v26_v55 = vld [vmem:[%s1486_s0 + $0x48] sm:$0xff] }
   0x8   :  { %v293_v34 = vmul.f32 %v670_v5, %v224_v28  ;;  %v353_v36 = vadd.f32 %v289_v13, %v156_v25  ;;  %v354_v37 = vadd.f32 %v290_v18, %v157_v26  ;;  %v159_v38 = vadd.f32 %v661_v2, %v90_v27  ;;  %v226_v44 = vld [vmem:[%s1488_s2 + $0x38] sm:$0xff]  ;;  %v227_v54 = vld [vmem:[%s1488_s2 + $0x40] sm:$0xff]  ;;  %v228_v60 = vld [vmem:[%s1488_s2 + $0x48] sm:$0xff] }
   0x9   :  { %v421_v35 = vadd.f32 %v676_v7, %v352_v24  ;;  %v355_v40 = vadd.f32 %v291_v20, %v158_v31  ;;  %v160_v41 = vadd.f32 %v661_v2, %v91_v33  ;;  %v92_v42 = vmul.f32 %v656_v1, %v23_v29  ;;  %v27_v3 = vld [vmem:[%s1486_s0 + $0x50] sm:$0xff]  ;;  %v28_v11 = vld [vmem:[%s1486_s0 + $0x58] sm:$0xff]  ;;  %v29_v17 = vld [vmem:[%s1486_s0 + $0x60] sm:$0xff] }
   0xa   :  { %v294_v43 = vmul.f32 %v670_v5, %v225_v30  ;;  %v422_v46 = vadd.f32 %v676_v7, %v353_v36  ;;  %v423_v47 = vadd.f32 %v676_v7, %v354_v37  ;;  %v356_v48 = vadd.f32 %v292_v32, %v159_v38  ;;  %v229_v4 = vld [vmem:[%s1488_s2 + $0x50] sm:$0xff]  ;;  %v230_v12 = vld [vmem:[%s1488_s2 + $0x58] sm:$0xff]  ;;  %v231_v22 = vld [vmem:[%s1488_s2 + $0x60] sm:$0xff] }
   0xb   :  { %v485_v45 = vmax.f32 %v421_v35, 0.0  ;;  %v424_v49 = vadd.f32 %v676_v7, %v355_v40  ;;  %v357_v50 = vadd.f32 %v293_v34, %v160_v41  ;;  %v161_v51 = vadd.f32 %v661_v2, %v92_v42  ;;  %v30_v23 = vld [vmem:[%s1486_s0 + $0x68] sm:$0xff]  ;;  %v31_v33 = vld [vmem:[%s1486_s0 + $0x70] sm:$0xff] }
   0xc   :  { %v93_v52 = vmul.f32 %v656_v1, %v24_v39  ;;  %v486_v56 = vmax.f32 %v422_v46, 0.0  ;;  %v487_v57 = vmax.f32 %v423_v47, 0.0  ;;  %v425_v58 = vadd.f32 %v676_v7, %v356_v48  ;;  %v232_v32 = vld [vmem:[%s1488_s2 + $0x68] sm:$0xff]  ;;  %v233_v42 = vld [vmem:[%s1488_s2 + $0x70] sm:$0xff]  ;;  %v32_v47 = vld [vmem:[%s1486_s0 + $0x78] sm:$0xff] }
   0xd   :  { %549 = vst [vmem:[%s1490_s4] sm:$0xff] %v485_v45  ;;  %v295_v59 = vmul.f32 %v670_v5, %v226_v44  ;;  %v488_v61 = vmax.f32 %v424_v49, 0.0  ;;  %v426_v62 = vadd.f32 %v676_v7, %v357_v50  ;;  %v358_v63 = vadd.f32 %v294_v43, %v161_v51  ;;  %v234_v48 = vld [vmem:[%s1488_s2 + $0x78] sm:$0xff] }
   0xe   :  { %v162_v0 = vadd.f32 %v661_v2, %v93_v52  ;;  %550 = vst [vmem:[%s1490_s4 + $0x8] sm:$0xff] %v486_v56  ;;  %551 = vst [vmem:[%s1490_s4 + $0x10] sm:$0xff] %v487_v57  ;;  %v489_v6 = vmax.f32 %v425_v58, 0.0  ;;  %v94_v8 = vmul.f32 %v656_v1, %v25_v53  ;;  %v296_v9 = vmul.f32 %v670_v5, %v227_v54  ;;  %v33_v53 = vld [vmem:[%s1486_s0 + $0x80] sm:$0xff] }
   0xf   :  { %v95_v10 = vmul.f32 %v656_v1, %v26_v55  ;;  %552 = vst [vmem:[%s1490_s4 + $0x18] sm:$0xff] %v488_v61  ;;  %v490_v13 = vmax.f32 %v426_v62, 0.0  ;;  %v427_v14 = vadd.f32 %v676_v7, %v358_v63  ;;  %v297_v16 = vmul.f32 %v670_v5, %v228_v60  ;;  %v235_v58 = vld [vmem:[%s1488_s2 + $0x80] sm:$0xff] }
  0x10   :  { %v359_v15 = vadd.f32 %v295_v59, %v162_v0  ;;  %553 = vst [vmem:[%s1490_s4 + $0x20] sm:$0xff] %v489_v6  ;;  %v163_v18 = vadd.f32 %v661_v2, %v94_v8  ;;  %v96_v20 = vmul.f32 %v656_v1, %v27_v3  ;;  %v298_v21 = vmul.f32 %v670_v5, %v229_v4  ;;  %v34_v59 = vld [vmem:[%s1486_s0 + $0x88] sm:$0xff] }
  0x11   :  { %v164_v19 = vadd.f32 %v661_v2, %v95_v10  ;;  %554 = vst [vmem:[%s1490_s4 + $0x28] sm:$0xff] %v490_v13  ;;  %v491_v24 = vmax.f32 %v427_v14, 0.0  ;;  %v97_v26 = vmul.f32 %v656_v1, %v28_v11  ;;  %v299_v27 = vmul.f32 %v670_v5, %v230_v12  ;;  %v236_v0 = vld [vmem:[%s1488_s2 + $0x88] sm:$0xff]  ;;  %v237_v10 = vld [vmem:[%s1488_s2 + $0x90] sm:$0xff] }
  0x12   :  { %v428_v25 = vadd.f32 %v676_v7, %v359_v15  ;;  %v360_v28 = vadd.f32 %v296_v9, %v163_v18  ;;  %v165_v30 = vadd.f32 %v661_v2, %v96_v20  ;;  %v98_v31 = vmul.f32 %v656_v1, %v29_v17  ;;  %v35_v9 = vld [vmem:[%s1486_s0 + $0x90] sm:$0xff]  ;;  %v36_v15 = vld [vmem:[%s1486_s0 + $0x98] sm:$0xff] }
  0x13   :  { %v361_v29 = vadd.f32 %v297_v16, %v164_v19  ;;  %555 = vst [vmem:[%s1490_s4 + $0x30] sm:$0xff] %v491_v24  ;;  %v166_v35 = vadd.f32 %v661_v2, %v97_v26  ;;  %v300_v36 = vmul.f32 %v670_v5, %v231_v22  ;;  %v99_v37 = vmul.f32 %v656_v1, %v30_v23  ;;  %v238_v16 = vld [vmem:[%s1488_s2 + $0x98] sm:$0xff]  ;;  %v239_v26 = vld [vmem:[%s1488_s2 + $0xa0] sm:$0xff] }
  0x14   :  { %v492_v34 = vmax.f32 %v428_v25, 0.0  ;;  %v429_v38 = vadd.f32 %v676_v7, %v360_v28  ;;  %v362_v40 = vadd.f32 %v298_v21, %v165_v30  ;;  %v167_v41 = vadd.f32 %v661_v2, %v98_v31  ;;  %v37_v21 = vld [vmem:[%s1486_s0 + $0xa0] sm:$0xff] }
  0x15   :  { %v430_v39 = vadd.f32 %v676_v7, %v361_v29  ;;  %v363_v43 = vadd.f32 %v299_v27, %v166_v35  ;;  %v168_v44 = vadd.f32 %v661_v2, %v99_v37  ;;  %v301_v45 = vmul.f32 %v670_v5, %v232_v32  ;;  %v38_v27 = vld [vmem:[%s1486_s0 + $0xa8] sm:$0xff] }
  0x16   :  { %556 = vst [vmem:[%s1490_s4 + $0x38] sm:$0xff] %v492_v34  ;;  %v100_v46 = vmul.f32 %v656_v1, %v31_v33  ;;  %v493_v49 = vmax.f32 %v429_v38, 0.0  ;;  %v431_v51 = vadd.f32 %v676_v7, %v362_v40  ;;  %v364_v52 = vadd.f32 %v300_v36, %v167_v41  ;;  %v240_v36 = vld [vmem:[%s1488_s2 + $0xa8] sm:$0xff]  ;;  %v39_v41 = vld [vmem:[%s1486_s0 + $0xb0] sm:$0xff] }
  0x17   :  { %v494_v50 = vmax.f32 %v430_v39, 0.0  ;;  %v432_v54 = vadd.f32 %v676_v7, %v363_v43  ;;  %v365_v55 = vadd.f32 %v301_v45, %v168_v44  ;;  %v302_v57 = vmul.f32 %v670_v5, %v233_v42 }
  0x18   :  { %v169_v56 = vadd.f32 %v661_v2, %v100_v46  ;;  %557 = vst [vmem:[%s1490_s4 + $0x40] sm:$0xff] %v493_v49  ;;  %v495_v60 = vmax.f32 %v431_v51, 0.0  ;;  %v433_v61 = vadd.f32 %v676_v7, %v364_v52  ;;  %v101_v62 = vmul.f32 %v656_v1, %v32_v47  ;;  %v241_v46 = vld [vmem:[%s1488_s2 + $0xb0] sm:$0xff]  ;;  %v40_v47 = vld [vmem:[%s1486_s0 + $0xb8] sm:$0xff] }
  0x19   :  { %558 = vst [vmem:[%s1490_s4 + $0x48] sm:$0xff] %v494_v50  ;;  %v303_v63 = vmul.f32 %v670_v5, %v234_v48  ;;  %v496_v3 = vmax.f32 %v432_v54, 0.0  ;;  %v434_v4 = vadd.f32 %v676_v7, %v365_v55  ;;  %v102_v8 = vmul.f32 %v656_v1, %v33_v53  ;;  %v242_v52 = vld [vmem:[%s1488_s2 + $0xb8] sm:$0xff] }
  0x1a   :  { %v366_v6 = vadd.f32 %v302_v57, %v169_v56  ;;  %559 = vst [vmem:[%s1490_s4 + $0x50] sm:$0xff] %v495_v60  ;;  %v497_v11 = vmax.f32 %v433_v61, 0.0  ;;  %v170_v12 = vadd.f32 %v661_v2, %v101_v62  ;;  %v304_v13 = vmul.f32 %v670_v5, %v235_v58  ;;  %v41_v57 = vld [vmem:[%s1486_s0 + $0xc0] sm:$0xff] }
  0x1b   :  { %v103_v14 = vmul.f32 %v656_v1, %v34_v59  ;;  %560 = vst [vmem:[%s1490_s4 + $0x58] sm:$0xff] %v496_v3  ;;  %v498_v17 = vmax.f32 %v434_v4, 0.0  ;;  %v171_v19 = vadd.f32 %v661_v2, %v102_v8  ;;  %v305_v20 = vmul.f32 %v670_v5, %v236_v0  ;;  %v243_v62 = vld [vmem:[%s1488_s2 + $0xc0] sm:$0xff]  ;;  %v244_v8 = vld [vmem:[%s1488_s2 + $0xc8] sm:$0xff] }
  0x1c   :  { %v435_v18 = vadd.f32 %v676_v7, %v366_v6  ;;  %561 = vst [vmem:[%s1490_s4 + $0x60] sm:$0xff] %v497_v11  ;;  %v367_v22 = vadd.f32 %v303_v63, %v170_v12  ;;  %v104_v24 = vmul.f32 %v656_v1, %v35_v9  ;;  %v306_v25 = vmul.f32 %v670_v5, %v237_v10  ;;  %v42_v63 = vld [vmem:[%s1486_s0 + $0xc8] sm:$0xff] }
  0x1d   :  { %v172_v23 = vadd.f32 %v661_v2, %v103_v14  ;;  %562 = vst [vmem:[%s1490_s4 + $0x68] sm:$0xff] %v498_v17  ;;  %v368_v29 = vadd.f32 %v304_v13, %v171_v19  ;;  %v105_v30 = vmul.f32 %v656_v1, %v36_v15  ;;  %v307_v31 = vmul.f32 %v670_v5, %v238_v16  ;;  %v43_v13 = vld [vmem:[%s1486_s0 + $0xd0] sm:$0xff]  ;;  %v44_v19 = vld [vmem:[%s1486_s0 + $0xd8] sm:$0xff] }
  0x1e   :  { %v499_v28 = vmax.f32 %v435_v18, 0.0  ;;  %v436_v32 = vadd.f32 %v676_v7, %v367_v22  ;;  %v173_v34 = vadd.f32 %v661_v2, %v104_v24  ;;  %v106_v35 = vmul.f32 %v656_v1, %v37_v21  ;;  %v245_v14 = vld [vmem:[%s1488_s2 + $0xd0] sm:$0xff] }
  0x1f   :  { %v369_v33 = vadd.f32 %v305_v20, %v172_v23  ;;  %v437_v37 = vadd.f32 %v676_v7, %v368_v29  ;;  %v174_v38 = vadd.f32 %v661_v2, %v105_v30  ;;  %v308_v39 = vmul.f32 %v670_v5, %v239_v26  ;;  %v246_v20 = vld [vmem:[%s1488_s2 + $0xd8] sm:$0xff]  ;;  %v247_v30 = vld [vmem:[%s1488_s2 + $0xe0] sm:$0xff] }
  0x20   :  { %563 = vst [vmem:[%s1490_s4 + $0x70] sm:$0xff] %v499_v28  ;;  %v107_v40 = vmul.f32 %v656_v1, %v38_v27  ;;  %v500_v42 = vmax.f32 %v436_v32, 0.0  ;;  %v370_v44 = vadd.f32 %v306_v25, %v173_v34  ;;  %v175_v45 = vadd.f32 %v661_v2, %v106_v35  ;;  %v45_v25 = vld [vmem:[%s1486_s0 + $0xe0] sm:$0xff]  ;;  %v46_v35 = vld [vmem:[%s1486_s0 + $0xe8] sm:$0xff] }
  0x21   :  { %v438_v43 = vadd.f32 %v676_v7, %v369_v33  ;;  %v501_v48 = vmax.f32 %v437_v37, 0.0  ;;  %v371_v49 = vadd.f32 %v307_v31, %v174_v38  ;;  %v309_v51 = vmul.f32 %v670_v5, %v240_v36 }
  0x22   :  { %v176_v50 = vadd.f32 %v661_v2, %v107_v40  ;;  %564 = vst [vmem:[%s1490_s4 + $0x78] sm:$0xff] %v500_v42  ;;  %v439_v54 = vadd.f32 %v676_v7, %v370_v44  ;;  %v372_v55 = vadd.f32 %v308_v39, %v175_v45  ;;  %v108_v56 = vmul.f32 %v656_v1, %v39_v41  ;;  %v248_v40 = vld [vmem:[%s1488_s2 + $0xe8] sm:$0xff]  ;;  %v47_v41 = vld [vmem:[%s1486_s0 + $0xf0] sm:$0xff] }
  0x23   :  { %v502_v53 = vmax.f32 %v438_v43, 0.0  ;;  %565 = vst [vmem:[%s1490_s4 + $0x80] sm:$0xff] %v501_v48  ;;  %v440_v58 = vadd.f32 %v676_v7, %v371_v49  ;;  %v310_v60 = vmul.f32 %v670_v5, %v241_v46  ;;  %v109_v61 = vmul.f32 %v656_v1, %v40_v47 }
  0x24   :  { %v373_v59 = vadd.f32 %v309_v51, %v176_v50  ;;  %v503_v0 = vmax.f32 %v439_v54, 0.0  ;;  %v441_v3 = vadd.f32 %v676_v7, %v372_v55  ;;  %v177_v4 = vadd.f32 %v661_v2, %v108_v56  ;;  %v249_v50 = vld [vmem:[%s1488_s2 + $0xf0] sm:$0xff]  ;;  %v48_v51 = vld [vmem:[%s1486_s0 + $0xf8] sm:$0xff] }
  0x25   :  { %566 = vst [vmem:[%s1490_s4 + $0x88] sm:$0xff] %v502_v53  ;;  %v311_v6 = vmul.f32 %v670_v5, %v242_v52  ;;  %v504_v9 = vmax.f32 %v440_v58, 0.0  ;;  %v178_v11 = vadd.f32 %v661_v2, %v109_v61  ;;  %v110_v12 = vmul.f32 %v656_v1, %v41_v57  ;;  %v250_v56 = vld [vmem:[%s1488_s2 + $0xf8] sm:$0xff]  ;;  %v49_v61 = vld [vmem:[%s1486_s0 + $0x100] sm:$0xff] }
  0x26   :  { %v442_v10 = vadd.f32 %v676_v7, %v373_v59  ;;  %567 = vst [vmem:[%s1490_s4 + $0x90] sm:$0xff] %v503_v0  ;;  %v505_v15 = vmax.f32 %v441_v3, 0.0  ;;  %v374_v16 = vadd.f32 %v310_v60, %v177_v4  ;;  %v312_v17 = vmul.f32 %v670_v5, %v243_v62  ;;  %v251_v4 = vld [vmem:[%s1488_s2 + $0x100] sm:$0xff] }
  0x27   :  { %v111_v18 = vmul.f32 %v656_v1, %v42_v63  ;;  %568 = vst [vmem:[%s1490_s4 + $0x98] sm:$0xff] %v504_v9  ;;  %v375_v22 = vadd.f32 %v311_v6, %v178_v11  ;;  %v179_v23 = vadd.f32 %v661_v2, %v110_v12  ;;  %v313_v24 = vmul.f32 %v670_v5, %v244_v8  ;;  %v50_v6 = vld [vmem:[%s1486_s0 + $0x108] sm:$0xff] }
  0x28   :  { %v506_v21 = vmax.f32 %v442_v10, 0.0  ;;  %569 = vst [vmem:[%s1490_s4 + $0xa0] sm:$0xff] %v505_v15  ;;  %v443_v26 = vadd.f32 %v676_v7, %v374_v16  ;;  %v112_v28 = vmul.f32 %v656_v1, %v43_v13  ;;  %v314_v29 = vmul.f32 %v670_v5, %v245_v14  ;;  %v252_v12 = vld [vmem:[%s1488_s2 + $0x108] sm:$0xff] }
  0x29   :  { %v180_v27 = vadd.f32 %v661_v2, %v111_v18  ;;  %v444_v31 = vadd.f32 %v676_v7, %v375_v22  ;;  %v376_v32 = vadd.f32 %v312_v17, %v179_v23  ;;  %v113_v33 = vmul.f32 %v656_v1, %v44_v19  ;;  %v51_v17 = vld [vmem:[%s1486_s0 + $0x110] sm:$0xff]  ;;  %v52_v23 = vld [vmem:[%s1486_s0 + $0x118] sm:$0xff] }
  0x2a   :  { %570 = vst [vmem:[%s1490_s4 + $0xa8] sm:$0xff] %v506_v21  ;;  %v315_v34 = vmul.f32 %v670_v5, %v246_v20  ;;  %v507_v36 = vmax.f32 %v443_v26, 0.0  ;;  %v181_v38 = vadd.f32 %v661_v2, %v112_v28  ;;  %v114_v39 = vmul.f32 %v656_v1, %v45_v25  ;;  %v253_v18 = vld [vmem:[%s1488_s2 + $0x110] sm:$0xff]  ;;  %v254_v28 = vld [vmem:[%s1488_s2 + $0x118] sm:$0xff] }
  0x2b   :  { %v377_v37 = vadd.f32 %v313_v24, %v180_v27  ;;  %v508_v42 = vmax.f32 %v444_v31, 0.0  ;;  %v445_v43 = vadd.f32 %v676_v7, %v376_v32  ;;  %v182_v44 = vadd.f32 %v661_v2, %v113_v33 }
  0x2c   :  { %v316_v45 = vmul.f32 %v670_v5, %v247_v30  ;;  %571 = vst [vmem:[%s1490_s4 + $0xb0] sm:$0xff] %v507_v36  ;;  %v378_v47 = vadd.f32 %v314_v29, %v181_v38  ;;  %v183_v48 = vadd.f32 %v661_v2, %v114_v39  ;;  %v115_v49 = vmul.f32 %v656_v1, %v46_v35  ;;  %v53_v29 = vld [vmem:[%s1486_s0 + $0x120] sm:$0xff]  ;;  %v54_v39 = vld [vmem:[%s1486_s0 + $0x128] sm:$0xff] }
  0x2d   :  { %v446_v46 = vadd.f32 %v676_v7, %v377_v37  ;;  %572 = vst [vmem:[%s1490_s4 + $0xb8] sm:$0xff] %v508_v42  ;;  %v509_v52 = vmax.f32 %v445_v43, 0.0  ;;  %v379_v53 = vadd.f32 %v315_v34, %v182_v44  ;;  %v317_v54 = vmul.f32 %v670_v5, %v248_v40  ;;  %v255_v34 = vld [vmem:[%s1488_s2 + $0x120] sm:$0xff]  ;;  %v256_v44 = vld [vmem:[%s1488_s2 + $0x128] sm:$0xff] }
  0x2e   :  { %v116_v55 = vmul.f32 %v656_v1, %v47_v41  ;;  %v447_v58 = vadd.f32 %v676_v7, %v378_v47  ;;  %v380_v59 = vadd.f32 %v316_v45, %v183_v48  ;;  %v184_v60 = vadd.f32 %v661_v2, %v115_v49  ;;  %v55_v45 = vld [vmem:[%s1486_s0 + $0x130] sm:$0xff] }
  0x2f   :  { %v510_v57 = vmax.f32 %v446_v46, 0.0  ;;  %573 = vst [vmem:[%s1490_s4 + $0xc0] sm:$0xff] %v509_v52  ;;  %v448_v62 = vadd.f32 %v676_v7, %v379_v53  ;;  %v318_v0 = vmul.f32 %v670_v5, %v249_v50  ;;  %v117_v3 = vmul.f32 %v656_v1, %v48_v51 }
  0x30   :  { %v185_v63 = vadd.f32 %v661_v2, %v116_v55  ;;  %v511_v8 = vmax.f32 %v447_v58, 0.0  ;;  %v449_v9 = vadd.f32 %v676_v7, %v380_v59  ;;  %v381_v10 = vadd.f32 %v317_v54, %v184_v60  ;;  %v257_v54 = vld [vmem:[%s1488_s2 + $0x130] sm:$0xff]  ;;  %v56_v55 = vld [vmem:[%s1486_s0 + $0x138] sm:$0xff] }
  0x31   :  { %574 = vst [vmem:[%s1490_s4 + $0xc8] sm:$0xff] %v510_v57  ;;  %v319_v11 = vmul.f32 %v670_v5, %v250_v56  ;;  %v512_v13 = vmax.f32 %v448_v62, 0.0  ;;  %v186_v15 = vadd.f32 %v661_v2, %v117_v3  ;;  %v118_v16 = vmul.f32 %v656_v1, %v49_v61  ;;  %v258_v60 = vld [vmem:[%s1488_s2 + $0x138] sm:$0xff]  ;;  %v57_v3 = vld [vmem:[%s1486_s0 + $0x140] sm:$0xff] }
  0x32   :  { %v382_v14 = vadd.f32 %v318_v0, %v185_v63  ;;  %575 = vst [vmem:[%s1490_s4 + $0xd0] sm:$0xff] %v511_v8  ;;  %v513_v19 = vmax.f32 %v449_v9, 0.0  ;;  %v450_v20 = vadd.f32 %v676_v7, %v381_v10  ;;  %v320_v21 = vmul.f32 %v670_v5, %v251_v4  ;;  %v259_v10 = vld [vmem:[%s1488_s2 + $0x140] sm:$0xff] }
  0x33   :  { %v119_v22 = vmul.f32 %v656_v1, %v50_v6  ;;  %576 = vst [vmem:[%s1490_s4 + $0xd8] sm:$0xff] %v512_v13  ;;  %v383_v25 = vadd.f32 %v319_v11, %v186_v15  ;;  %v187_v26 = vadd.f32 %v661_v2, %v118_v16  ;;  %v321_v27 = vmul.f32 %v670_v5, %v252_v12  ;;  %v58_v11 = vld [vmem:[%s1486_s0 + $0x148] sm:$0xff] }
  0x34   :  { %v451_v24 = vadd.f32 %v676_v7, %v382_v14  ;;  %577 = vst [vmem:[%s1490_s4 + $0xe0] sm:$0xff] %v513_v19  ;;  %v514_v30 = vmax.f32 %v450_v20, 0.0  ;;  %v120_v32 = vmul.f32 %v656_v1, %v51_v17  ;;  %v322_v33 = vmul.f32 %v670_v5, %v253_v18  ;;  %v260_v16 = vld [vmem:[%s1488_s2 + $0x148] sm:$0xff] }
  0x35   :  { %v188_v31 = vadd.f32 %v661_v2, %v119_v22  ;;  %v452_v36 = vadd.f32 %v676_v7, %v383_v25  ;;  %v384_v37 = vadd.f32 %v320_v21, %v187_v26  ;;  %v121_v38 = vmul.f32 %v656_v1, %v52_v23  ;;  %v59_v21 = vld [vmem:[%s1486_s0 + $0x150] sm:$0xff] }
  0x36   :  { %v515_v35 = vmax.f32 %v451_v24, 0.0  ;;  %578 = vst [vmem:[%s1490_s4 + $0xe8] sm:$0xff] %v514_v30  ;;  %v189_v41 = vadd.f32 %v661_v2, %v120_v32  ;;  %v323_v42 = vmul.f32 %v670_v5, %v254_v28  ;;  %v122_v43 = vmul.f32 %v656_v1, %v53_v29  ;;  %v261_v22 = vld [vmem:[%s1488_s2 + $0x150] sm:$0xff]  ;;  %v262_v32 = vld [vmem:[%s1488_s2 + $0x158] sm:$0xff] }
  0x37   :  { %v385_v40 = vadd.f32 %v321_v27, %v188_v31  ;;  %v516_v46 = vmax.f32 %v452_v36, 0.0  ;;  %v453_v47 = vadd.f32 %v676_v7, %v384_v37  ;;  %v190_v48 = vadd.f32 %v661_v2, %v121_v38  ;;  %v60_v27 = vld [vmem:[%s1486_s0 + $0x158] sm:$0xff]  ;;  %v263_v38 = vld [vmem:[%s1488_s2 + $0x160] sm:$0xff] }
  0x38   :  { %579 = vst [vmem:[%s1490_s4 + $0xf0] sm:$0xff] %v515_v35  ;;  %v324_v49 = vmul.f32 %v670_v5, %v255_v34  ;;  %v386_v51 = vadd.f32 %v322_v33, %v189_v41  ;;  %v191_v52 = vadd.f32 %v661_v2, %v122_v43  ;;  %v123_v53 = vmul.f32 %v656_v1, %v54_v39  ;;  %v61_v33 = vld [vmem:[%s1486_s0 + $0x160] sm:$0xff]  ;;  %v62_v43 = vld [vmem:[%s1486_s0 + $0x168] sm:$0xff] }
  0x39   :  { %v454_v50 = vadd.f32 %v676_v7, %v385_v40  ;;  %580 = vst [vmem:[%s1490_s4 + $0xf8] sm:$0xff] %v516_v46  ;;  %v517_v56 = vmax.f32 %v453_v47, 0.0  ;;  %v387_v57 = vadd.f32 %v323_v42, %v190_v48  ;;  %v325_v58 = vmul.f32 %v670_v5, %v256_v44  ;;  %v264_v48 = vld [vmem:[%s1488_s2 + $0x168] sm:$0xff] }
  0x3a   :  { %v124_v59 = vmul.f32 %v656_v1, %v55_v45  ;;  %v455_v62 = vadd.f32 %v676_v7, %v386_v51  ;;  %v388_v63 = vadd.f32 %v324_v49, %v191_v52  ;;  %v192_v0 = vadd.f32 %v661_v2, %v123_v53  ;;  %v63_v49 = vld [vmem:[%s1486_s0 + $0x170] sm:$0xff] }
  0x3b   :  { %v518_v61 = vmax.f32 %v454_v50, 0.0  ;;  %581 = vst [vmem:[%s1490_s4 + $0x100] sm:$0xff] %v517_v56  ;;  %v456_v4 = vadd.f32 %v676_v7, %v387_v57  ;;  %v326_v8 = vmul.f32 %v670_v5, %v257_v54  ;;  %v125_v9 = vmul.f32 %v656_v1, %v56_v55 }
  0x3c   :  { %v193_v6 = vadd.f32 %v661_v2, %v124_v59  ;;  %v519_v12 = vmax.f32 %v455_v62, 0.0  ;;  %v457_v13 = vadd.f32 %v676_v7, %v388_v63  ;;  %v389_v14 = vadd.f32 %v325_v58, %v192_v0  ;;  %v265_v58 = vld [vmem:[%s1488_s2 + $0x170] sm:$0xff]  ;;  %v64_v59 = vld [vmem:[%s1486_s0 + $0x178] sm:$0xff] }
  0x3d   :  { %582 = vst [vmem:[%s1490_s4 + $0x108] sm:$0xff] %v518_v61  ;;  %v327_v15 = vmul.f32 %v670_v5, %v258_v60  ;;  %v520_v17 = vmax.f32 %v456_v4, 0.0  ;;  %v194_v19 = vadd.f32 %v661_v2, %v125_v9  ;;  %v126_v20 = vmul.f32 %v656_v1, %v57_v3  ;;  %v266_v0 = vld [vmem:[%s1488_s2 + $0x178] sm:$0xff]  ;;  %v65_v9 = vld [vmem:[%s1486_s0 + $0x180] sm:$0xff] }
  0x3e   :  { %v390_v18 = vadd.f32 %v326_v8, %v193_v6  ;;  %583 = vst [vmem:[%s1490_s4 + $0x110] sm:$0xff] %v519_v12  ;;  %v521_v23 = vmax.f32 %v457_v13, 0.0  ;;  %v458_v24 = vadd.f32 %v676_v7, %v389_v14  ;;  %v328_v25 = vmul.f32 %v670_v5, %v259_v10  ;;  %v267_v14 = vld [vmem:[%s1488_s2 + $0x180] sm:$0xff] }
  0x3f   :  { %v127_v26 = vmul.f32 %v656_v1, %v58_v11  ;;  %584 = vst [vmem:[%s1490_s4 + $0x118] sm:$0xff] %v520_v17  ;;  %v391_v29 = vadd.f32 %v327_v15, %v194_v19  ;;  %v195_v30 = vadd.f32 %v661_v2, %v126_v20  ;;  %v329_v31 = vmul.f32 %v670_v5, %v260_v16  ;;  %v66_v15 = vld [vmem:[%s1486_s0 + $0x188] sm:$0xff] }
  0x40   :  { %v459_v28 = vadd.f32 %v676_v7, %v390_v18  ;;  %585 = vst [vmem:[%s1490_s4 + $0x120] sm:$0xff] %v521_v23  ;;  %v522_v34 = vmax.f32 %v458_v24, 0.0  ;;  %v128_v36 = vmul.f32 %v656_v1, %v59_v21  ;;  %v330_v37 = vmul.f32 %v670_v5, %v261_v22  ;;  %v268_v20 = vld [vmem:[%s1488_s2 + $0x188] sm:$0xff] }
  0x41   :  { %v196_v35 = vadd.f32 %v661_v2, %v127_v26  ;;  %v460_v40 = vadd.f32 %v676_v7, %v391_v29  ;;  %v392_v41 = vadd.f32 %v328_v25, %v195_v30  ;;  %v129_v42 = vmul.f32 %v656_v1, %v60_v27  ;;  %v67_v25 = vld [vmem:[%s1486_s0 + $0x190] sm:$0xff] }
  0x42   :  { %v523_v39 = vmax.f32 %v459_v28, 0.0  ;;  %586 = vst [vmem:[%s1490_s4 + $0x128] sm:$0xff] %v522_v34  ;;  %v197_v45 = vadd.f32 %v661_v2, %v128_v36  ;;  %v331_v46 = vmul.f32 %v670_v5, %v262_v32  ;;  %v130_v47 = vmul.f32 %v656_v1, %v61_v33  ;;  %v269_v26 = vld [vmem:[%s1488_s2 + $0x190] sm:$0xff]  ;;  %v270_v36 = vld [vmem:[%s1488_s2 + $0x198] sm:$0xff] }
  0x43   :  { %v393_v44 = vadd.f32 %v329_v31, %v196_v35  ;;  %v524_v50 = vmax.f32 %v460_v40, 0.0  ;;  %v461_v51 = vadd.f32 %v676_v7, %v392_v41  ;;  %v198_v52 = vadd.f32 %v661_v2, %v129_v42  ;;  %v68_v31 = vld [vmem:[%s1486_s0 + $0x198] sm:$0xff]  ;;  %v271_v42 = vld [vmem:[%s1488_s2 + $0x1a0] sm:$0xff] }
  0x44   :  { %587 = vst [vmem:[%s1490_s4 + $0x130] sm:$0xff] %v523_v39  ;;  %v332_v53 = vmul.f32 %v670_v5, %v263_v38  ;;  %v394_v55 = vadd.f32 %v330_v37, %v197_v45  ;;  %v199_v56 = vadd.f32 %v661_v2, %v130_v47  ;;  %v131_v57 = vmul.f32 %v656_v1, %v62_v43  ;;  %v69_v37 = vld [vmem:[%s1486_s0 + $0x1a0] sm:$0xff]  ;;  %v70_v47 = vld [vmem:[%s1486_s0 + $0x1a8] sm:$0xff] }
  0x45   :  { %v462_v54 = vadd.f32 %v676_v7, %v393_v44  ;;  %588 = vst [vmem:[%s1490_s4 + $0x138] sm:$0xff] %v524_v50  ;;  %v525_v60 = vmax.f32 %v461_v51, 0.0  ;;  %v395_v61 = vadd.f32 %v331_v46, %v198_v52  ;;  %v333_v62 = vmul.f32 %v670_v5, %v264_v48  ;;  %v272_v52 = vld [vmem:[%s1488_s2 + $0x1a8] sm:$0xff] }
  0x46   :  { %v132_v63 = vmul.f32 %v656_v1, %v63_v49  ;;  %v463_v4 = vadd.f32 %v676_v7, %v394_v55  ;;  %v396_v6 = vadd.f32 %v332_v53, %v199_v56  ;;  %v200_v8 = vadd.f32 %v661_v2, %v131_v57  ;;  %v71_v53 = vld [vmem:[%s1486_s0 + $0x1b0] sm:$0xff] }
  0x47   :  { %v526_v3 = vmax.f32 %v462_v54, 0.0  ;;  %589 = vst [vmem:[%s1490_s4 + $0x140] sm:$0xff] %v525_v60  ;;  %v464_v10 = vadd.f32 %v676_v7, %v395_v61  ;;  %v334_v12 = vmul.f32 %v670_v5, %v265_v58  ;;  %v133_v13 = vmul.f32 %v656_v1, %v64_v59 }
  0x48   :  { %v201_v11 = vadd.f32 %v661_v2, %v132_v63  ;;  %v527_v16 = vmax.f32 %v463_v4, 0.0  ;;  %v465_v17 = vadd.f32 %v676_v7, %v396_v6  ;;  %v397_v18 = vadd.f32 %v333_v62, %v200_v8  ;;  %v273_v62 = vld [vmem:[%s1488_s2 + $0x1b0] sm:$0xff]  ;;  %v72_v63 = vld [vmem:[%s1486_s0 + $0x1b8] sm:$0xff] }
  0x49   :  { %590 = vst [vmem:[%s1490_s4 + $0x148] sm:$0xff] %v526_v3  ;;  %v335_v19 = vmul.f32 %v670_v5, %v266_v0  ;;  %v528_v21 = vmax.f32 %v464_v10, 0.0  ;;  %v202_v23 = vadd.f32 %v661_v2, %v133_v13  ;;  %v134_v24 = vmul.f32 %v656_v1, %v65_v9  ;;  %v274_v8 = vld [vmem:[%s1488_s2 + $0x1b8] sm:$0xff]  ;;  %v73_v13 = vld [vmem:[%s1486_s0 + $0x1c0] sm:$0xff] }
  0x4a   :  { %v398_v22 = vadd.f32 %v334_v12, %v201_v11  ;;  %591 = vst [vmem:[%s1490_s4 + $0x150] sm:$0xff] %v527_v16  ;;  %v529_v27 = vmax.f32 %v465_v17, 0.0  ;;  %v466_v28 = vadd.f32 %v676_v7, %v397_v18  ;;  %v336_v29 = vmul.f32 %v670_v5, %v267_v14  ;;  %v275_v18 = vld [vmem:[%s1488_s2 + $0x1c0] sm:$0xff] }
  0x4b   :  { %v135_v30 = vmul.f32 %v656_v1, %v66_v15  ;;  %592 = vst [vmem:[%s1490_s4 + $0x158] sm:$0xff] %v528_v21  ;;  %v399_v33 = vadd.f32 %v335_v19, %v202_v23  ;;  %v203_v34 = vadd.f32 %v661_v2, %v134_v24  ;;  %v337_v35 = vmul.f32 %v670_v5, %v268_v20  ;;  %v74_v19 = vld [vmem:[%s1486_s0 + $0x1c8] sm:$0xff] }
  0x4c   :  { %v467_v32 = vadd.f32 %v676_v7, %v398_v22  ;;  %593 = vst [vmem:[%s1490_s4 + $0x160] sm:$0xff] %v529_v27  ;;  %v530_v38 = vmax.f32 %v466_v28, 0.0  ;;  %v136_v40 = vmul.f32 %v656_v1, %v67_v25  ;;  %v338_v41 = vmul.f32 %v670_v5, %v269_v26  ;;  %v276_v24 = vld [vmem:[%s1488_s2 + $0x1c8] sm:$0xff] }
  0x4d   :  { %v204_v39 = vadd.f32 %v661_v2, %v135_v30  ;;  %v468_v44 = vadd.f32 %v676_v7, %v399_v33  ;;  %v400_v45 = vadd.f32 %v336_v29, %v203_v34  ;;  %v137_v46 = vmul.f32 %v656_v1, %v68_v31  ;;  %v75_v29 = vld [vmem:[%s1486_s0 + $0x1d0] sm:$0xff] }
  0x4e   :  { %v531_v43 = vmax.f32 %v467_v32, 0.0  ;;  %594 = vst [vmem:[%s1490_s4 + $0x168] sm:$0xff] %v530_v38  ;;  %v205_v49 = vadd.f32 %v661_v2, %v136_v40  ;;  %v339_v50 = vmul.f32 %v670_v5, %v270_v36  ;;  %v138_v51 = vmul.f32 %v656_v1, %v69_v37  ;;  %v277_v30 = vld [vmem:[%s1488_s2 + $0x1d0] sm:$0xff]  ;;  %v278_v40 = vld [vmem:[%s1488_s2 + $0x1d8] sm:$0xff] }
  0x4f   :  { %v401_v48 = vadd.f32 %v337_v35, %v204_v39  ;;  %v532_v54 = vmax.f32 %v468_v44, 0.0  ;;  %v469_v55 = vadd.f32 %v676_v7, %v400_v45  ;;  %v206_v56 = vadd.f32 %v661_v2, %v137_v46  ;;  %v76_v35 = vld [vmem:[%s1486_s0 + $0x1d8] sm:$0xff]  ;;  %v279_v45 = vld [vmem:[%s1488_s2 + $0x1e0] sm:$0xff] }
  0x50   :  { %595 = vst [vmem:[%s1490_s4 + $0x170] sm:$0xff] %v531_v43  ;;  %v340_v57 = vmul.f32 %v670_v5, %v271_v42  ;;  %v402_v59 = vadd.f32 %v338_v41, %v205_v49  ;;  %v207_v60 = vadd.f32 %v661_v2, %v138_v51  ;;  %v139_v61 = vmul.f32 %v656_v1, %v70_v47  ;;  %v623_v43 = vld [vmem:[%s1489_s3] ss:$0 sm:$0xff]  ;;  %v624_v47 = vld [vmem:[%s1489_s3 + $0x1] ss:$0 sm:$0xff]  ;;  %v78_v51 = vld [vmem:[%s1486_s0 + $0x1e8] sm:$0xff] }
  0x51   :  { %v470_v58 = vadd.f32 %v676_v7, %v401_v48  ;;  %596 = vst [vmem:[%s1490_s4 + $0x178] sm:$0xff] %v532_v54  ;;  %v533_v0 = vmax.f32 %v469_v55, 0.0  ;;  %v403_v3 = vadd.f32 %v339_v50, %v206_v56  ;;  %v341_v4 = vmul.f32 %v670_v5, %v272_v52  ;;  %v280_v56 = vld [vmem:[%s1488_s2 + $0x1e8] sm:$0xff] }
  0x52   :  { %v140_v6 = vmul.f32 %v656_v1, %v71_v53  ;;  %v471_v10 = vadd.f32 %v676_v7, %v402_v59  ;;  %v404_v11 = vadd.f32 %v340_v57, %v207_v60  ;;  %v208_v12 = vadd.f32 %v661_v2, %v139_v61  ;;  %v79_v57 = vld [vmem:[%s1486_s0 + $0x1f0] sm:$0xff] }
  0x53   :  { %v534_v9 = vmax.f32 %v470_v58, 0.0  ;;  %597 = vst [vmem:[%s1490_s4 + $0x180] sm:$0xff] %v533_v0  ;;  %v472_v14 = vadd.f32 %v676_v7, %v403_v3  ;;  %v342_v16 = vmul.f32 %v670_v5, %v273_v62  ;;  %v141_v17 = vmul.f32 %v656_v1, %v72_v63 }
  0x54   :  { %v209_v15 = vadd.f32 %v661_v2, %v140_v6  ;;  %v535_v20 = vmax.f32 %v471_v10, 0.0  ;;  %v473_v21 = vadd.f32 %v676_v7, %v404_v11  ;;  %v405_v22 = vadd.f32 %v341_v4, %v208_v12  ;;  %v281_v4 = vld [vmem:[%s1488_s2 + $0x1f0] sm:$0xff]  ;;  %v80_v6 = vld [vmem:[%s1486_s0 + $0x1f8] sm:$0xff] }
  0x55   :  { %598 = vst [vmem:[%s1490_s4 + $0x188] sm:$0xff] %v534_v9  ;;  %v343_v23 = vmul.f32 %v670_v5, %v274_v8  ;;  %v536_v25 = vmax.f32 %v472_v14, 0.0  ;;  %v210_v27 = vadd.f32 %v661_v2, %v141_v17  ;;  %v142_v28 = vmul.f32 %v656_v1, %v73_v13  ;;  %v282_v12 = vld [vmem:[%s1488_s2 + $0x1f8] sm:$0xff] }
  0x56   :  { %v406_v26 = vadd.f32 %v342_v16, %v209_v15  ;;  %599 = vst [vmem:[%s1490_s4 + $0x190] sm:$0xff] %v535_v20  ;;  %v537_v31 = vmax.f32 %v473_v21, 0.0  ;;  %v474_v32 = vadd.f32 %v676_v7, %v405_v22  ;;  %v344_v33 = vmul.f32 %v670_v5, %v275_v18 }
  0x57   :  { %v143_v34 = vmul.f32 %v656_v1, %v74_v19  ;;  %600 = vst [vmem:[%s1490_s4 + $0x198] sm:$0xff] %v536_v25  ;;  %v407_v37 = vadd.f32 %v343_v23, %v210_v27  ;;  %v211_v38 = vadd.f32 %v661_v2, %v142_v28  ;;  %v345_v39 = vmul.f32 %v670_v5, %v276_v24  ;;  %v77_v1 = vld [vmem:[%s1486_s0 + $0x1e0] sm:$0xff] }
  0x58   :  { %v475_v36 = vadd.f32 %v676_v7, %v406_v26  ;;  %601 = vst [vmem:[%s1490_s4 + $0x1a0] sm:$0xff] %v537_v31  ;;  %v538_v41 = vmax.f32 %v474_v32, 0.0  ;;  %v621_v7 = vld [vmem:[%s1487_s1 + $0x1] ss:$0 sm:$0xff]  ;;  %v622_v5 = vld [vmem:[%s1487_s1] ss:$0 sm:$0xff]  ;;  %v346_v44 = vmul.f32 %v623_v43, %v277_v30  ;;  %v347_v54 = vmul.f32 %v623_v43, %v278_v40 }
  0x59   :  { %v212_v2 = vadd.f32 %v621_v7, %v143_v34  ;;  %v144_v42 = vmul.f32 %v622_v5, %v75_v29  ;;  %v476_v48 = vadd.f32 %v624_v47, %v407_v37  ;;  %v408_v49 = vadd.f32 %v344_v33, %v211_v38 }
  0x5a   :  { %v539_v46 = vmax.f32 %v475_v36, 0.0  ;;  %v145_v50 = vmul.f32 %v622_v5, %v76_v35  ;;  %602 = vst [vmem:[%s1490_s4 + $0x1a8] sm:$0xff] %v538_v41  ;;  %v146_v55 = vmul.f32 %v622_v5, %v77_v1  ;;  %v348_v61 = vmul.f32 %v623_v43, %v279_v45 }
  0x5b   :  { %v409_v52 = vadd.f32 %v345_v39, %v212_v2  ;;  %v213_v53 = vadd.f32 %v621_v7, %v144_v42  ;;  %v540_v58 = vmax.f32 %v476_v48, 0.0  ;;  %v477_v59 = vadd.f32 %v624_v47, %v408_v49 }
  0x5c   :  { %603 = vst [vmem:[%s1490_s4 + $0x1b0] sm:$0xff] %v539_v46  ;;  %v214_v60 = vadd.f32 %v621_v7, %v145_v50  ;;  %v215_v0 = vadd.f32 %v621_v7, %v146_v55  ;;  %v147_v3 = vmul.f32 %v622_v5, %v78_v51  ;;  %v349_v10 = vmul.f32 %v623_v43, %v280_v56 }
  0x5d   :  { %v478_v62 = vadd.f32 %v624_v47, %v409_v52  ;;  %v410_v63 = vadd.f32 %v346_v44, %v213_v53  ;;  %604 = vst [vmem:[%s1490_s4 + $0x1b8] sm:$0xff] %v540_v58  ;;  %v541_v8 = vmax.f32 %v477_v59, 0.0  ;;  %v148_v11 = vmul.f32 %v622_v5, %v79_v57 }
  0x5e   :  { %v411_v9 = vadd.f32 %v347_v54, %v214_v60  ;;  %v412_v15 = vadd.f32 %v348_v61, %v215_v0  ;;  %v216_v16 = vadd.f32 %v621_v7, %v147_v3  ;;  %v350_v19 = vmul.f32 %v623_v43, %v281_v4 }
  0x5f   :  { %v542_v13 = vmax.f32 %v478_v62, 0.0  ;;  %v479_v14 = vadd.f32 %v624_v47, %v410_v63  ;;  %605 = vst [vmem:[%s1490_s4 + $0x1c0] sm:$0xff] %v541_v8  ;;  %v217_v18 = vadd.f32 %v621_v7, %v148_v11  ;;  %v149_v20 = vmul.f32 %v622_v5, %v80_v6 }
  0x60   :  { %v480_v17 = vadd.f32 %v624_v47, %v411_v9  ;;  %v481_v22 = vadd.f32 %v624_v47, %v412_v15  ;;  %v413_v23 = vadd.f32 %v349_v10, %v216_v16  ;;  %v351_v24 = vmul.f32 %v623_v43, %v282_v12 }
  0x61   :  { %606 = vst [vmem:[%s1490_s4 + $0x1c8] sm:$0xff] %v542_v13  ;;  %v543_v21 = vmax.f32 %v479_v14, 0.0  ;;  %v414_v26 = vadd.f32 %v350_v19, %v217_v18  ;;  %v218_v27 = vadd.f32 %v621_v7, %v149_v20 }
  0x62   :  { %v544_v25 = vmax.f32 %v480_v17, 0.0  ;;  %v545_v28 = vmax.f32 %v481_v22, 0.0  ;;  %v482_v29 = vadd.f32 %v624_v47, %v413_v23 }
  0x63   :  { %607 = vst [vmem:[%s1490_s4 + $0x1d0] sm:$0xff] %v543_v21  ;;  %v483_v30 = vadd.f32 %v624_v47, %v414_v26  ;;  %v415_v31 = vadd.f32 %v351_v24, %v218_v27 }
  0x64   :  { %608 = vst [vmem:[%s1490_s4 + $0x1d8] sm:$0xff] %v544_v25  ;;  %609 = vst [vmem:[%s1490_s4 + $0x1e0] sm:$0xff] %v545_v28  ;;  %v546_v32 = vmax.f32 %v482_v29, 0.0 }
  0x65   :  { %v547_v33 = vmax.f32 %v483_v30, 0.0  ;;  %v484_v34 = vadd.f32 %v624_v47, %v415_v31 }
  0x66   :  { %610 = vst [vmem:[%s1490_s4 + $0x1e8] sm:$0xff] %v546_v32 }
  0x67   :  { %611 = vst [vmem:[%s1490_s4 + $0x1f0] sm:$0xff] %v547_v33  ;;  %v548_v35 = vmax.f32 %v484_v34, 0.0 }
  0x69   :  { %612 = vst [vmem:[%s1490_s4 + $0x1f8] sm:$0xff] %v548_v35 }

</bundles_post_ra>
